<compile_context>
chip_gen: v7x
topology: tpu7x:2x2x1
jax: 0.10.0
libtpu: 0.0.40
codegen_flags: <defaults>
</compile_context>

<pallas_src>
import functools

import jax
import jax.numpy as jnp
from jax.experimental import pallas as pl
from jax.experimental.pallas import tpu as pltpu


def cab_kernel(x_ref, mask_ref, w1_ref, b1_ref, w2_ref, b2_ref, wd_ref, wu_ref,
               o_ref, cols_ref, *, K, H, W, C, NB):
    """One group of NB images per grid step.

    x_ref:    (1, C, NB*H*W)   spatial (+batch) on lanes, channels on sublanes
    mask_ref: (K*K, 1, NB*H*W) 0/1 halo masks, grid-invariant (hoisted to wrapper)
    w1/w2:    (C, K*K*C)       flattened conv weights (kh outer, kw, c_in inner)
    b1/b2:    (C, 1)
    wd:       (Cr, C), wu: (C, Cr)  channel-attention 1x1 convs (no bias)
    cols_ref: (K*K*C, NB*H*W)  shared VMEM im2col scratch, reused by both convs
    """
    HW = H * W
    L = NB * HW
    pad = K // 2
    x = x_ref[0].astype(jnp.float32)                         # (C, L)

    def build_cols(inp):
        # Each tap = static lane rotation of the whole slab (pltpu.roll -> XLU)
        # zeroed on the halo by the precomputed mask, written straight into its
        # sublane band of the shared im2col scratch.  The halo mask also zeroes
        # every lane that would wrap across an image boundary, so the NB-image
        # lane concatenation is safe.
        t = 0
        for kh in range(K):
            for kw in range(K):
                off = (kh - pad) * W + (kw - pad)
                r = (-off) % L                                # np.roll-style shift
                tap = pltpu.roll(inp, r, axis=1) if r else inp
                cols_ref[t * C:(t + 1) * C, :] = tap * mask_ref[t]
                t += 1

    def conv_kxk(inp, w_ref, b_ref):
        # One MXU matmul per conv, contraction K*K*C.
        # TODO(synk): on v6e/v7x with production channel counts, cast cols and
        # weights to bf16 (keep f32 accumulation) for ~3x MXU throughput; this
        # needs a looser tolerance than the 1e-4 check below, so kept f32 here.
        build_cols(inp)
        return jnp.dot(w_ref[...], cols_ref[...],
                       preferred_element_type=jnp.float32) + b_ref[...]

    # body: conv -> ReLU -> conv   (all lane-dense)
    y = conv_kxk(x, w1_ref, b1_ref)
    y = jnp.maximum(y, 0.0)
    y = conv_kxk(y, w2_ref, b2_ref)                           # (C, L)

    # channel attention (batched over the NB images of this slab):
    # GAP -> 1x1 down (no bias) -> ReLU -> 1x1 up -> sigmoid
    pooled = jnp.concatenate(
        [jnp.mean(y[:, b * HW:(b + 1) * HW], axis=1, keepdims=True)
         for b in range(NB)], axis=1)                         # (C, NB)
    hid = jnp.maximum(
        jnp.dot(wd_ref[...], pooled, preferred_element_type=jnp.float32), 0.0)
    att = jax.nn.sigmoid(
        jnp.dot(wu_ref[...], hid, preferred_element_type=jnp.float32))    # (C, NB)

    # per-channel scale + residual; per-image stores are 128-aligned (HW=256)
    # -> dense, unmasked vst.
    for b in range(NB):
        lo, hi = b * HW, (b + 1) * HW
        o_ref[0, :, lo:hi] = (y[:, lo:hi] * att[:, b:b + 1]
                              + x[:, lo:hi]).astype(o_ref.dtype)


def channel_attention_block(x_nchw, w1, b1, w2, b2, wd, wu, *, nb=1):
    """x_nchw: (N, C, H, W).  w1/w2: (K, K, C, C) HWIO.  b1/b2: (1, C).
    wd: (C, C//r), wu: (C//r, C) — attention 1x1 convs (no bias).
    nb: images per grid step (N % nb == 0; keep N//nb >= 2 for v7x megacore)."""
    N, C, H, W = x_nchw.shape
    K = w1.shape[0]
    Cr = wd.shape[1]
    HW = H * W
    assert K % 2 == 1, "roll+halo-mask conv matches PyTorch padding=K//2 only for odd K"
    assert N % nb == 0
    G = N // nb
    L = nb * HW
    pad = K // 2

    # Group nb images per grid step, concatenated along lanes: (G, C, nb*HW).
    x_g = (x_nchw.reshape(G, nb, C, HW)
           .transpose(0, 2, 1, 3)
           .reshape(G, C, L))

    # Grid-invariant halo masks, one (1, L) row per tap (hoisted out of kernel).
    flat = jnp.arange(HW)
    row, col = flat // W, flat % W
    masks = []
    for kh in range(K):
        for kw in range(K):
            dh, dw = kh - pad, kw - pad
            masks.append((row + dh >= 0) & (row + dh < H) &
                         (col + dw >= 0) & (col + dw < W))
    mask = jnp.stack(masks, axis=0).astype(jnp.float32)       # (K*K, HW)
    mask = jnp.tile(mask[:, None, :], (1, nb, 1)).reshape(K * K, 1, L)

    # Flatten conv weights to (C_out, K*K*C_in), matching the im2col row order
    # (kh outer, kw middle, c_in inner); transpose the 1x1 attention weights so
    # the kernel computes (Cr,C)@(C,NB) and (C,Cr)@(Cr,NB) directly.
    w1f = jnp.transpose(w1, (3, 0, 1, 2)).reshape(C, K * K * C)
    w2f = jnp.transpose(w2, (3, 0, 1, 2)).reshape(C, K * K * C)
    b1c = b1.reshape(C, 1)
    b2c = b2.reshape(C, 1)
    wdt = wd.T                                                # (Cr, C)
    wut = wu.T                                                # (C, Cr)

    # NOTE(production shapes, e.g. 256x256x64): tile HW into row bands with a
    # (K-1)-row halo (or drop im2col for K*K accumulating contraction-C
    # matmuls into an f32 VMEM accumulator), re-derive the band size for v7x's
    # 64 MiB VMEM, set vmem_limit_bytes explicitly, and single-buffer the
    # constant-index_map weight operands (pipeline_mode=pl.Buffered(1)).
    out = pl.pallas_call(
        functools.partial(cab_kernel, K=K, H=H, W=W, C=C, NB=nb),
        out_shape=jax.ShapeDtypeStruct((G, C, L), x_nchw.dtype),
        grid_spec=pltpu.PrefetchScalarGridSpec(
            num_scalar_prefetch=0,
            grid=(G,),
            in_specs=[
                pl.BlockSpec((1, C, L), lambda g: (g, 0, 0)),        # x slab
                pl.BlockSpec((K * K, 1, L), lambda g: (0, 0, 0)),    # halo masks
                pl.BlockSpec((C, K * K * C), lambda g: (0, 0)),      # w1 flattened
                pl.BlockSpec((C, 1), lambda g: (0, 0)),              # b1
                pl.BlockSpec((C, K * K * C), lambda g: (0, 0)),      # w2 flattened
                pl.BlockSpec((C, 1), lambda g: (0, 0)),              # b2
                pl.BlockSpec((Cr, C), lambda g: (0, 0)),             # wd^T (1x1 down)
                pl.BlockSpec((C, Cr), lambda g: (0, 0)),             # wu^T (1x1 up)
            ],
            out_specs=pl.BlockSpec((1, C, L), lambda g: (g, 0, 0)),
            scratch_shapes=[pltpu.VMEM((K * K * C, L), jnp.float32)],  # shared im2col
        ),
        # Each grid step writes a distinct output block -> truly parallel
        # (lets v7x's two TensorCores split the batch; no-op on v5e/v6e).
        compiler_params=pltpu.CompilerParams(dimension_semantics=("parallel",)),
    )(x_g, mask, w1f, b1c, w2f, b2c, wdt, wut)

    return (out.reshape(G, C, nb, HW)
            .transpose(0, 2, 1, 3)
            .reshape(N, C, H, W))


def reference(x_nchw, params):
    """Pure-JAX reference for correctness checking."""
    w1, b1, w2, b2, wd, wu = params
    x = jnp.transpose(x_nchw, (0, 2, 3, 1))
    dn = ('NHWC', 'HWIO', 'NHWC')
    y = jax.lax.conv_general_dilated(x, w1, (1, 1), 'SAME',
                                     dimension_numbers=dn) + b1.reshape(1, 1, 1, -1)
    y = jnp.maximum(y, 0.0)
    y = jax.lax.conv_general_dilated(y, w2, (1, 1), 'SAME',
                                     dimension_numbers=dn) + b2.reshape(1, 1, 1, -1)
    pooled = jnp.mean(y, axis=(1, 2))                         # (N, C)
    hid = jnp.maximum(pooled @ wd, 0.0)
    att = jax.nn.sigmoid(hid @ wu)                            # (N, C)
    out = y * att[:, None, None, :] + x
    return jnp.transpose(out, (0, 3, 1, 2))


if __name__ == "__main__":
    N, C, H, W = 4, 8, 16, 16
    reduction, K = 4, 3
    Cr = C // reduction

    key = jax.random.PRNGKey(0)
    kx, k1, k2, k3, k4, k5, k6 = jax.random.split(key, 7)
    x = jax.random.normal(kx, (N, C, H, W), jnp.float32)

    # Deterministic synthetic parameters (HWIO conv weights, (1,C) biases).
    w1 = jax.random.normal(k1, (K, K, C, C), jnp.float32) * 0.1
    b1 = jax.random.normal(k2, (1, C), jnp.float32) * 0.1
    w2 = jax.random.normal(k3, (K, K, C, C), jnp.float32) * 0.1
    b2 = jax.random.normal(k4, (1, C), jnp.float32) * 0.1
    wd = jax.random.normal(k5, (C, Cr), jnp.float32) * 0.1    # 1x1 conv C -> C//r (no bias)
    wu = jax.random.normal(k6, (Cr, C), jnp.float32) * 0.1    # 1x1 conv C//r -> C (no bias)

    # nb=2 images per grid step -> grid of N//nb = 2 parallel steps.
    out = channel_attention_block(x, w1, b1, w2, b2, wd, wu, nb=2)
    out = jax.block_until_ready(out)

    ref = reference(x, (w1, b1, w2, b2, wd, wu))
    assert out.shape == (N, C, H, W)
    assert jnp.allclose(out, ref, atol=1e-4, rtol=1e-4), "mismatch vs JAX reference"

    print("KERNEL_OK")
</pallas_src>

<mosaic_0001>
module attributes {stable_mosaic.version = 11 : i64} {
  func.func @cab_kernel(%arg0: i32, %arg1: memref<1x8x512xf32, #tpu.memory_space<vmem>>, %arg2: memref<9x1x512xf32, #tpu.memory_space<vmem>>, %arg3: memref<8x72xf32, #tpu.memory_space<vmem>>, %arg4: memref<8x1xf32, #tpu.memory_space<vmem>>, %arg5: memref<8x72xf32, #tpu.memory_space<vmem>>, %arg6: memref<8x1xf32, #tpu.memory_space<vmem>>, %arg7: memref<2x8xf32, #tpu.memory_space<vmem>>, %arg8: memref<8x2xf32, #tpu.memory_space<vmem>>, %arg9: memref<1x8x512xf32, #tpu.memory_space<vmem>>, %arg10: memref<72x512xf32, #tpu.memory_space<vmem>>) attributes {dimension_semantics = [#tpu.dimension_semantics<parallel>], iteration_bounds = array<i64: 2>, scalar_prefetch = 0 : i64, scratch_operands = 1 : i64, tpu.core_type = #tpu.core_type<tc>, window_params = [{transform_indices = @transform_0, window_bounds = array<i64: 1, 8, 512>}, {pipeline_mode = #tpu.pipeline_mode<synchronous>, transform_indices = @transform_1, window_bounds = array<i64: 9, 1, 512>}, {pipeline_mode = #tpu.pipeline_mode<synchronous>, transform_indices = @transform_2, window_bounds = array<i64: 8, 72>}, {pipeline_mode = #tpu.pipeline_mode<synchronous>, transform_indices = @transform_3, window_bounds = array<i64: 8, 1>}, {pipeline_mode = #tpu.pipeline_mode<synchronous>, transform_indices = @transform_4, window_bounds = array<i64: 8, 72>}, {pipeline_mode = #tpu.pipeline_mode<synchronous>, transform_indices = @transform_5, window_bounds = array<i64: 8, 1>}, {pipeline_mode = #tpu.pipeline_mode<synchronous>, transform_indices = @transform_6, window_bounds = array<i64: 2, 8>}, {pipeline_mode = #tpu.pipeline_mode<synchronous>, transform_indices = @transform_7, window_bounds = array<i64: 8, 2>}, {transform_indices = @transform_8, window_bounds = array<i64: 1, 8, 512>}]} {
    %c0 = arith.constant 0 : index
    %c0_0 = arith.constant 0 : index
    %c0_1 = arith.constant 0 : index
    %0 = vector.load %arg1[%c0, %c0_0, %c0_1] : memref<1x8x512xf32, #tpu.memory_space<vmem>>, vector<1x8x512xf32>
    %1 = vector.shape_cast %0 : vector<1x8x512xf32> to vector<8x512xf32>
    %c17_i32 = arith.constant 17 : i32
    %2 = tpu.dynamic_rotate %1 by %c17_i32 dim 1 : vector<8x512xf32>, i32 -> vector<8x512xf32>
    %c0_2 = arith.constant 0 : index
    %c0_3 = arith.constant 0 : index
    %c0_4 = arith.constant 0 : index
    %3 = vector.load %arg2[%c0_2, %c0_3, %c0_4] : memref<9x1x512xf32, #tpu.memory_space<vmem>>, vector<1x1x512xf32>
    %4 = vector.shape_cast %3 : vector<1x1x512xf32> to vector<1x512xf32>
    %5 = vector.broadcast %4 : vector<1x512xf32> to vector<8x512xf32>
    %6 = arith.mulf %2, %5 : vector<8x512xf32>
    %c0_5 = arith.constant 0 : index
    %c0_6 = arith.constant 0 : index
    %7 = vector.load %arg10[%c0_5, %c0_6] : memref<72x512xf32, #tpu.memory_space<vmem>>, vector<8x512xf32>
    tpu.vector_store %arg10[%c0_5, %c0_6], %6 {strides = array<i32>} : memref<72x512xf32, #tpu.memory_space<vmem>>, vector<8x512xf32>,
    %c16_i32 = arith.constant 16 : i32
    %8 = tpu.dynamic_rotate %1 by %c16_i32 dim 1 : vector<8x512xf32>, i32 -> vector<8x512xf32>
    %c1 = arith.constant 1 : index
    %c0_7 = arith.constant 0 : index
    %c0_8 = arith.constant 0 : index
    %9 = vector.load %arg2[%c1, %c0_7, %c0_8] : memref<9x1x512xf32, #tpu.memory_space<vmem>>, vector<1x1x512xf32>
    %10 = vector.shape_cast %9 : vector<1x1x512xf32> to vector<1x512xf32>
    %11 = vector.broadcast %10 : vector<1x512xf32> to vector<8x512xf32>
    %12 = arith.mulf %8, %11 : vector<8x512xf32>
    %c8 = arith.constant 8 : index
    %c0_9 = arith.constant 0 : index
    %13 = vector.load %arg10[%c8, %c0_9] : memref<72x512xf32, #tpu.memory_space<vmem>>, vector<8x512xf32>
    tpu.vector_store %arg10[%c8, %c0_9], %12 {strides = array<i32>} : memref<72x512xf32, #tpu.memory_space<vmem>>, vector<8x512xf32>,
    %c15_i32 = arith.constant 15 : i32
    %14 = tpu.dynamic_rotate %1 by %c15_i32 dim 1 : vector<8x512xf32>, i32 -> vector<8x512xf32>
    %c2 = arith.constant 2 : index
    %c0_10 = arith.constant 0 : index
    %c0_11 = arith.constant 0 : index
    %15 = vector.load %arg2[%c2, %c0_10, %c0_11] : memref<9x1x512xf32, #tpu.memory_space<vmem>>, vector<1x1x512xf32>
    %16 = vector.shape_cast %15 : vector<1x1x512xf32> to vector<1x512xf32>
    %17 = vector.broadcast %16 : vector<1x512xf32> to vector<8x512xf32>
    %18 = arith.mulf %14, %17 : vector<8x512xf32>
    %c16 = arith.constant 16 : index
    %c0_12 = arith.constant 0 : index
    %19 = vector.load %arg10[%c16, %c0_12] : memref<72x512xf32, #tpu.memory_space<vmem>>, vector<8x512xf32>
    tpu.vector_store %arg10[%c16, %c0_12], %18 {strides = array<i32>} : memref<72x512xf32, #tpu.memory_space<vmem>>, vector<8x512xf32>,
    %c1_i32 = arith.constant 1 : i32
    %20 = tpu.dynamic_rotate %1 by %c1_i32 dim 1 : vector<8x512xf32>, i32 -> vector<8x512xf32>
    %c3 = arith.constant 3 : index
    %c0_13 = arith.constant 0 : index
    %c0_14 = arith.constant 0 : index
    %21 = vector.load %arg2[%c3, %c0_13, %c0_14] : memref<9x1x512xf32, #tpu.memory_space<vmem>>, vector<1x1x512xf32>
    %22 = vector.shape_cast %21 : vector<1x1x512xf32> to vector<1x512xf32>
    %23 = vector.broadcast %22 : vector<1x512xf32> to vector<8x512xf32>
    %24 = arith.mulf %20, %23 : vector<8x512xf32>
    %c24 = arith.constant 24 : index
    %c0_15 = arith.constant 0 : index
    %25 = vector.load %arg10[%c24, %c0_15] : memref<72x512xf32, #tpu.memory_space<vmem>>, vector<8x512xf32>
    tpu.vector_store %arg10[%c24, %c0_15], %24 {strides = array<i32>} : memref<72x512xf32, #tpu.memory_space<vmem>>, vector<8x512xf32>,
    %c4 = arith.constant 4 : index
    %c0_16 = arith.constant 0 : index
    %c0_17 = arith.constant 0 : index
    %26 = vector.load %arg2[%c4, %c0_16, %c0_17] : memref<9x1x512xf32, #tpu.memory_space<vmem>>, vector<1x1x512xf32>
    %27 = vector.shape_cast %26 : vector<1x1x512xf32> to vector<1x512xf32>
    %28 = vector.broadcast %27 : vector<1x512xf32> to vector<8x512xf32>
    %29 = arith.mulf %1, %28 : vector<8x512xf32>
    %c32 = arith.constant 32 : index
    %c0_18 = arith.constant 0 : index
    %30 = vector.load %arg10[%c32, %c0_18] : memref<72x512xf32, #tpu.memory_space<vmem>>, vector<8x512xf32>
    tpu.vector_store %arg10[%c32, %c0_18], %29 {strides = array<i32>} : memref<72x512xf32, #tpu.memory_space<vmem>>, vector<8x512xf32>,
    %c511_i32 = arith.constant 511 : i32
    %31 = tpu.dynamic_rotate %1 by %c511_i32 dim 1 : vector<8x512xf32>, i32 -> vector<8x512xf32>
    %c5 = arith.constant 5 : index
    %c0_19 = arith.constant 0 : index
    %c0_20 = arith.constant 0 : index
    %32 = vector.load %arg2[%c5, %c0_19, %c0_20] : memref<9x1x512xf32, #tpu.memory_space<vmem>>, vector<1x1x512xf32>
    %33 = vector.shape_cast %32 : vector<1x1x512xf32> to vector<1x512xf32>
    %34 = vector.broadcast %33 : vector<1x512xf32> to vector<8x512xf32>
    %35 = arith.mulf %31, %34 : vector<8x512xf32>
    %c40 = arith.constant 40 : index
    %c0_21 = arith.constant 0 : index
    %36 = vector.load %arg10[%c40, %c0_21] : memref<72x512xf32, #tpu.memory_space<vmem>>, vector<8x512xf32>
    tpu.vector_store %arg10[%c40, %c0_21], %35 {strides = array<i32>} : memref<72x512xf32, #tpu.memory_space<vmem>>, vector<8x512xf32>,
    %c497_i32 = arith.constant 497 : i32
    %37 = tpu.dynamic_rotate %1 by %c497_i32 dim 1 : vector<8x512xf32>, i32 -> vector<8x512xf32>
    %c6 = arith.constant 6 : index
    %c0_22 = arith.constant 0 : index
    %c0_23 = arith.constant 0 : index
    %38 = vector.load %arg2[%c6, %c0_22, %c0_23] : memref<9x1x512xf32, #tpu.memory_space<vmem>>, vector<1x1x512xf32>
    %39 = vector.shape_cast %38 : vector<1x1x512xf32> to vector<1x512xf32>
    %40 = vector.broadcast %39 : vector<1x512xf32> to vector<8x512xf32>
    %41 = arith.mulf %37, %40 : vector<8x512xf32>
    %c48 = arith.constant 48 : index
    %c0_24 = arith.constant 0 : index
    %42 = vector.load %arg10[%c48, %c0_24] : memref<72x512xf32, #tpu.memory_space<vmem>>, vector<8x512xf32>
    tpu.vector_store %arg10[%c48, %c0_24], %41 {strides = array<i32>} : memref<72x512xf32, #tpu.memory_space<vmem>>, vector<8x512xf32>,
    %c496_i32 = arith.constant 496 : i32
    %43 = tpu.dynamic_rotate %1 by %c496_i32 dim 1 : vector<8x512xf32>, i32 -> vector<8x512xf32>
    %c7 = arith.constant 7 : index
    %c0_25 = arith.constant 0 : index
    %c0_26 = arith.constant 0 : index
    %44 = vector.load %arg2[%c7, %c0_25, %c0_26] : memref<9x1x512xf32, #tpu.memory_space<vmem>>, vector<1x1x512xf32>
    %45 = vector.shape_cast %44 : vector<1x1x512xf32> to vector<1x512xf32>
    %46 = vector.broadcast %45 : vector<1x512xf32> to vector<8x512xf32>
    %47 = arith.mulf %43, %46 : vector<8x512xf32>
    %c56 = arith.constant 56 : index
    %c0_27 = arith.constant 0 : index
    %48 = vector.load %arg10[%c56, %c0_27] : memref<72x512xf32, #tpu.memory_space<vmem>>, vector<8x512xf32>
    tpu.vector_store %arg10[%c56, %c0_27], %47 {strides = array<i32>} : memref<72x512xf32, #tpu.memory_space<vmem>>, vector<8x512xf32>,
    %c495_i32 = arith.constant 495 : i32
    %49 = tpu.dynamic_rotate %1 by %c495_i32 dim 1 : vector<8x512xf32>, i32 -> vector<8x512xf32>
    %c8_28 = arith.constant 8 : index
    %c0_29 = arith.constant 0 : index
    %c0_30 = arith.constant 0 : index
    %50 = vector.load %arg2[%c8_28, %c0_29, %c0_30] : memref<9x1x512xf32, #tpu.memory_space<vmem>>, vector<1x1x512xf32>
    %51 = vector.shape_cast %50 : vector<1x1x512xf32> to vector<1x512xf32>
    %52 = vector.broadcast %51 : vector<1x512xf32> to vector<8x512xf32>
    %53 = arith.mulf %49, %52 : vector<8x512xf32>
    %c64 = arith.constant 64 : index
    %c0_31 = arith.constant 0 : index
    %54 = vector.load %arg10[%c64, %c0_31] : memref<72x512xf32, #tpu.memory_space<vmem>>, vector<8x512xf32>
    tpu.vector_store %arg10[%c64, %c0_31], %53 {strides = array<i32>} : memref<72x512xf32, #tpu.memory_space<vmem>>, vector<8x512xf32>,
    %c0_32 = arith.constant 0 : index
    %c0_33 = arith.constant 0 : index
    %55 = vector.load %arg3[%c0_32, %c0_33] : memref<8x72xf32, #tpu.memory_space<vmem>>, vector<8x72xf32>
    %c0_34 = arith.constant 0 : index
    %c0_35 = arith.constant 0 : index
    %56 = vector.load %arg10[%c0_34, %c0_35] : memref<72x512xf32, #tpu.memory_space<vmem>>, vector<72x512xf32>
    %cst = arith.constant dense<0.000000e+00> : vector<8x512xf32>
    %57 = tpu.matmul %55, %56, %cst {dimension_numbers = #tpu.dot_dimension_numbers<[1], [0], [0], [1], [0, 0, 1, 1], [], []>} : vector<8x72xf32>, vector<72x512xf32>, vector<8x512xf32> -> vector<8x512xf32>
    %c0_36 = arith.constant 0 : index
    %c0_37 = arith.constant 0 : index
    %58 = vector.load %arg4[%c0_36, %c0_37] : memref<8x1xf32, #tpu.memory_space<vmem>>, vector<8x1xf32>
    %59 = vector.broadcast %58 : vector<8x1xf32> to vector<8x512xf32>
    %60 = arith.addf %57, %59 : vector<8x512xf32>
    %cst_38 = arith.constant 0.000000e+00 : f32
    %61 = vector.broadcast %cst_38 : f32 to vector<8x512xf32>
    %62 = arith.maximumf %60, %61 : vector<8x512xf32>
    %c17_i32_39 = arith.constant 17 : i32
    %63 = tpu.dynamic_rotate %62 by %c17_i32_39 dim 1 : vector<8x512xf32>, i32 -> vector<8x512xf32>
    %c0_40 = arith.constant 0 : index
    %c0_41 = arith.constant 0 : index
    %c0_42 = arith.constant 0 : index
    %64 = vector.load %arg2[%c0_40, %c0_41, %c0_42] : memref<9x1x512xf32, #tpu.memory_space<vmem>>, vector<1x1x512xf32>
    %65 = vector.shape_cast %64 : vector<1x1x512xf32> to vector<1x512xf32>
    %66 = vector.broadcast %65 : vector<1x512xf32> to vector<8x512xf32>
    %67 = arith.mulf %63, %66 : vector<8x512xf32>
    %c0_43 = arith.constant 0 : index
    %c0_44 = arith.constant 0 : index
    %68 = vector.load %arg10[%c0_43, %c0_44] : memref<72x512xf32, #tpu.memory_space<vmem>>, vector<8x512xf32>
    tpu.vector_store %arg10[%c0_43, %c0_44], %67 {strides = array<i32>} : memref<72x512xf32, #tpu.memory_space<vmem>>, vector<8x512xf32>,
    %c16_i32_45 = arith.constant 16 : i32
    %69 = tpu.dynamic_rotate %62 by %c16_i32_45 dim 1 : vector<8x512xf32>, i32 -> vector<8x512xf32>
    %c1_46 = arith.constant 1 : index
    %c0_47 = arith.constant 0 : index
    %c0_48 = arith.constant 0 : index
    %70 = vector.load %arg2[%c1_46, %c0_47, %c0_48] : memref<9x1x512xf32, #tpu.memory_space<vmem>>, vector<1x1x512xf32>
    %71 = vector.shape_cast %70 : vector<1x1x512xf32> to vector<1x512xf32>
    %72 = vector.broadcast %71 : vector<1x512xf32> to vector<8x512xf32>
    %73 = arith.mulf %69, %72 : vector<8x512xf32>
    %c8_49 = arith.constant 8 : index
    %c0_50 = arith.constant 0 : index
    %74 = vector.load %arg10[%c8_49, %c0_50] : memref<72x512xf32, #tpu.memory_space<vmem>>, vector<8x512xf32>
    tpu.vector_store %arg10[%c8_49, %c0_50], %73 {strides = array<i32>} : memref<72x512xf32, #tpu.memory_space<vmem>>, vector<8x512xf32>,
    %c15_i32_51 = arith.constant 15 : i32
    %75 = tpu.dynamic_rotate %62 by %c15_i32_51 dim 1 : vector<8x512xf32>, i32 -> vector<8x512xf32>
    %c2_52 = arith.constant 2 : index
    %c0_53 = arith.constant 0 : index
    %c0_54 = arith.constant 0 : index
    %76 = vector.load %arg2[%c2_52, %c0_53, %c0_54] : memref<9x1x512xf32, #tpu.memory_space<vmem>>, vector<1x1x512xf32>
    %77 = vector.shape_cast %76 : vector<1x1x512xf32> to vector<1x512xf32>
    %78 = vector.broadcast %77 : vector<1x512xf32> to vector<8x512xf32>
    %79 = arith.mulf %75, %78 : vector<8x512xf32>
    %c16_55 = arith.constant 16 : index
    %c0_56 = arith.constant 0 : index
    %80 = vector.load %arg10[%c16_55, %c0_56] : memref<72x512xf32, #tpu.memory_space<vmem>>, vector<8x512xf32>
    tpu.vector_store %arg10[%c16_55, %c0_56], %79 {strides = array<i32>} : memref<72x512xf32, #tpu.memory_space<vmem>>, vector<8x512xf32>,
    %c1_i32_57 = arith.constant 1 : i32
    %81 = tpu.dynamic_rotate %62 by %c1_i32_57 dim 1 : vector<8x512xf32>, i32 -> vector<8x512xf32>
    %c3_58 = arith.constant 3 : index
    %c0_59 = arith.constant 0 : index
    %c0_60 = arith.constant 0 : index
    %82 = vector.load %arg2[%c3_58, %c0_59, %c0_60] : memref<9x1x512xf32, #tpu.memory_space<vmem>>, vector<1x1x512xf32>
    %83 = vector.shape_cast %82 : vector<1x1x512xf32> to vector<1x512xf32>
    %84 = vector.broadcast %83 : vector<1x512xf32> to vector<8x512xf32>
    %85 = arith.mulf %81, %84 : vector<8x512xf32>
    %c24_61 = arith.constant 24 : index
    %c0_62 = arith.constant 0 : index
    %86 = vector.load %arg10[%c24_61, %c0_62] : memref<72x512xf32, #tpu.memory_space<vmem>>, vector<8x512xf32>
    tpu.vector_store %arg10[%c24_61, %c0_62], %85 {strides = array<i32>} : memref<72x512xf32, #tpu.memory_space<vmem>>, vector<8x512xf32>,
    %c4_63 = arith.constant 4 : index
    %c0_64 = arith.constant 0 : index
    %c0_65 = arith.constant 0 : index
    %87 = vector.load %arg2[%c4_63, %c0_64, %c0_65] : memref<9x1x512xf32, #tpu.memory_space<vmem>>, vector<1x1x512xf32>
    %88 = vector.shape_cast %87 : vector<1x1x512xf32> to vector<1x512xf32>
    %89 = vector.broadcast %88 : vector<1x512xf32> to vector<8x512xf32>
    %90 = arith.mulf %62, %89 : vector<8x512xf32>
    %c32_66 = arith.constant 32 : index
    %c0_67 = arith.constant 0 : index
    %91 = vector.load %arg10[%c32_66, %c0_67] : memref<72x512xf32, #tpu.memory_space<vmem>>, vector<8x512xf32>
    tpu.vector_store %arg10[%c32_66, %c0_67], %90 {strides = array<i32>} : memref<72x512xf32, #tpu.memory_space<vmem>>, vector<8x512xf32>,
    %c511_i32_68 = arith.constant 511 : i32
    %92 = tpu.dynamic_rotate %62 by %c511_i32_68 dim 1 : vector<8x512xf32>, i32 -> vector<8x512xf32>
    %c5_69 = arith.constant 5 : index
    %c0_70 = arith.constant 0 : index
    %c0_71 = arith.constant 0 : index
    %93 = vector.load %arg2[%c5_69, %c0_70, %c0_71] : memref<9x1x512xf32, #tpu.memory_space<vmem>>, vector<1x1x512xf32>
    %94 = vector.shape_cast %93 : vector<1x1x512xf32> to vector<1x512xf32>
    %95 = vector.broadcast %94 : vector<1x512xf32> to vector<8x512xf32>
    %96 = arith.mulf %92, %95 : vector<8x512xf32>
    %c40_72 = arith.constant 40 : index
    %c0_73 = arith.constant 0 : index
    %97 = vector.load %arg10[%c40_72, %c0_73] : memref<72x512xf32, #tpu.memory_space<vmem>>, vector<8x512xf32>
    tpu.vector_store %arg10[%c40_72, %c0_73], %96 {strides = array<i32>} : memref<72x512xf32, #tpu.memory_space<vmem>>, vector<8x512xf32>,
    %c497_i32_74 = arith.constant 497 : i32
    %98 = tpu.dynamic_rotate %62 by %c497_i32_74 dim 1 : vector<8x512xf32>, i32 -> vector<8x512xf32>
    %c6_75 = arith.constant 6 : index
    %c0_76 = arith.constant 0 : index
    %c0_77 = arith.constant 0 : index
    %99 = vector.load %arg2[%c6_75, %c0_76, %c0_77] : memref<9x1x512xf32, #tpu.memory_space<vmem>>, vector<1x1x512xf32>
    %100 = vector.shape_cast %99 : vector<1x1x512xf32> to vector<1x512xf32>
    %101 = vector.broadcast %100 : vector<1x512xf32> to vector<8x512xf32>
    %102 = arith.mulf %98, %101 : vector<8x512xf32>
    %c48_78 = arith.constant 48 : index
    %c0_79 = arith.constant 0 : index
    %103 = vector.load %arg10[%c48_78, %c0_79] : memref<72x512xf32, #tpu.memory_space<vmem>>, vector<8x512xf32>
    tpu.vector_store %arg10[%c48_78, %c0_79], %102 {strides = array<i32>} : memref<72x512xf32, #tpu.memory_space<vmem>>, vector<8x512xf32>,
    %c496_i32_80 = arith.constant 496 : i32
    %104 = tpu.dynamic_rotate %62 by %c496_i32_80 dim 1 : vector<8x512xf32>, i32 -> vector<8x512xf32>
    %c7_81 = arith.constant 7 : index
    %c0_82 = arith.constant 0 : index
    %c0_83 = arith.constant 0 : index
    %105 = vector.load %arg2[%c7_81, %c0_82, %c0_83] : memref<9x1x512xf32, #tpu.memory_space<vmem>>, vector<1x1x512xf32>
    %106 = vector.shape_cast %105 : vector<1x1x512xf32> to vector<1x512xf32>
    %107 = vector.broadcast %106 : vector<1x512xf32> to vector<8x512xf32>
    %108 = arith.mulf %104, %107 : vector<8x512xf32>
    %c56_84 = arith.constant 56 : index
    %c0_85 = arith.constant 0 : index
    %109 = vector.load %arg10[%c56_84, %c0_85] : memref<72x512xf32, #tpu.memory_space<vmem>>, vector<8x512xf32>
    tpu.vector_store %arg10[%c56_84, %c0_85], %108 {strides = array<i32>} : memref<72x512xf32, #tpu.memory_space<vmem>>, vector<8x512xf32>,
    %c495_i32_86 = arith.constant 495 : i32
    %110 = tpu.dynamic_rotate %62 by %c495_i32_86 dim 1 : vector<8x512xf32>, i32 -> vector<8x512xf32>
    %c8_87 = arith.constant 8 : index
    %c0_88 = arith.constant 0 : index
    %c0_89 = arith.constant 0 : index
    %111 = vector.load %arg2[%c8_87, %c0_88, %c0_89] : memref<9x1x512xf32, #tpu.memory_space<vmem>>, vector<1x1x512xf32>
    %112 = vector.shape_cast %111 : vector<1x1x512xf32> to vector<1x512xf32>
    %113 = vector.broadcast %112 : vector<1x512xf32> to vector<8x512xf32>
    %114 = arith.mulf %110, %113 : vector<8x512xf32>
    %c64_90 = arith.constant 64 : index
    %c0_91 = arith.constant 0 : index
    %115 = vector.load %arg10[%c64_90, %c0_91] : memref<72x512xf32, #tpu.memory_space<vmem>>, vector<8x512xf32>
    tpu.vector_store %arg10[%c64_90, %c0_91], %114 {strides = array<i32>} : memref<72x512xf32, #tpu.memory_space<vmem>>, vector<8x512xf32>,
    %c0_92 = arith.constant 0 : index
    %c0_93 = arith.constant 0 : index
    %116 = vector.load %arg5[%c0_92, %c0_93] : memref<8x72xf32, #tpu.memory_space<vmem>>, vector<8x72xf32>
    %c0_94 = arith.constant 0 : index
    %c0_95 = arith.constant 0 : index
    %117 = vector.load %arg10[%c0_94, %c0_95] : memref<72x512xf32, #tpu.memory_space<vmem>>, vector<72x512xf32>
    %cst_96 = arith.constant dense<0.000000e+00> : vector<8x512xf32>
    %118 = tpu.matmul %116, %117, %cst_96 {dimension_numbers = #tpu.dot_dimension_numbers<[1], [0], [0], [1], [0, 0, 1, 1], [], []>} : vector<8x72xf32>, vector<72x512xf32>, vector<8x512xf32> -> vector<8x512xf32>
    %c0_97 = arith.constant 0 : index
    %c0_98 = arith.constant 0 : index
    %119 = vector.load %arg6[%c0_97, %c0_98] : memref<8x1xf32, #tpu.memory_space<vmem>>, vector<8x1xf32>
    %120 = vector.broadcast %119 : vector<8x1xf32> to vector<8x512xf32>
    %121 = arith.addf %118, %120 : vector<8x512xf32>
    %122 = vector.extract_strided_slice %121 {offsets = [0, 0], sizes = [8, 256], strides = [1, 1]} : vector<8x512xf32> to vector<8x256xf32>
    %cst_99 = arith.constant dense<0.000000e+00> : vector<8xf32>
    %123 = vector.multi_reduction <add>, %122, %cst_99 [1] : vector<8x256xf32> to vector<8xf32>
    %124 = vector.shape_cast %123 : vector<8xf32> to vector<8x1xf32>
    %cst_100 = arith.constant 2.560000e+02 : f32
    %125 = vector.broadcast %cst_100 : f32 to vector<8x1xf32>
    %126 = arith.divf %124, %125 : vector<8x1xf32>
    %127 = vector.extract_strided_slice %121 {offsets = [0, 256], sizes = [8, 256], strides = [1, 1]} : vector<8x512xf32> to vector<8x256xf32>
    %cst_101 = arith.constant dense<0.000000e+00> : vector<8xf32>
    %128 = vector.multi_reduction <add>, %127, %cst_101 [1] : vector<8x256xf32> to vector<8xf32>
    %129 = vector.shape_cast %128 : vector<8xf32> to vector<8x1xf32>
    %cst_102 = arith.constant 2.560000e+02 : f32
    %130 = vector.broadcast %cst_102 : f32 to vector<8x1xf32>
    %131 = arith.divf %129, %130 : vector<8x1xf32>
    %132 = tpu.concatenate %126, %131 in 1 : vector<8x1xf32>, vector<8x1xf32> -> vector<8x2xf32>
    %c0_103 = arith.constant 0 : index
    %c0_104 = arith.constant 0 : index
    %133 = vector.load %arg7[%c0_103, %c0_104] : memref<2x8xf32, #tpu.memory_space<vmem>>, vector<2x8xf32>
    %cst_105 = arith.constant dense<0.000000e+00> : vector<2x2xf32>
    %134 = tpu.matmul %133, %132, %cst_105 {dimension_numbers = #tpu.dot_dimension_numbers<[1], [0], [0], [1], [0, 0, 1, 1], [], []>} : vector<2x8xf32>, vector<8x2xf32>, vector<2x2xf32> -> vector<2x2xf32>
    %cst_106 = arith.constant 0.000000e+00 : f32
    %135 = vector.broadcast %cst_106 : f32 to vector<2x2xf32>
    %136 = arith.maximumf %134, %135 : vector<2x2xf32>
    %c0_107 = arith.constant 0 : index
    %c0_108 = arith.constant 0 : index
    %137 = vector.load %arg8[%c0_107, %c0_108] : memref<8x2xf32, #tpu.memory_space<vmem>>, vector<8x2xf32>
    %cst_109 = arith.constant dense<0.000000e+00> : vector<8x2xf32>
    %138 = tpu.matmul %137, %136, %cst_109 {dimension_numbers = #tpu.dot_dimension_numbers<[1], [0], [0], [1], [0, 0, 1, 1], [], []>} : vector<8x2xf32>, vector<2x2xf32>, vector<8x2xf32> -> vector<8x2xf32>
    %139 = arith.negf %138 : vector<8x2xf32>
    %140 = math.exp %139 : vector<8x2xf32>
    %cst_110 = arith.constant 1.000000e+00 : f32
    %141 = vector.broadcast %cst_110 : f32 to vector<8x2xf32>
    %142 = arith.addf %141, %140 : vector<8x2xf32>
    %143 = arith.divf %141, %142 : vector<8x2xf32>
    %144 = vector.extract_strided_slice %121 {offsets = [0, 0], sizes = [8, 256], strides = [1, 1]} : vector<8x512xf32> to vector<8x256xf32>
    %145 = vector.extract_strided_slice %143 {offsets = [0, 0], sizes = [8, 1], strides = [1, 1]} : vector<8x2xf32> to vector<8x1xf32>
    %146 = vector.broadcast %145 : vector<8x1xf32> to vector<8x256xf32>
    %147 = arith.mulf %144, %146 : vector<8x256xf32>
    %148 = vector.extract_strided_slice %1 {offsets = [0, 0], sizes = [8, 256], strides = [1, 1]} : vector<8x512xf32> to vector<8x256xf32>
    %149 = arith.addf %147, %148 : vector<8x256xf32>
    %c0_111 = arith.constant 0 : index
    %c0_112 = arith.constant 0 : index
    %c0_113 = arith.constant 0 : index
    %150 = vector.load %arg9[%c0_111, %c0_112, %c0_113] : memref<1x8x512xf32, #tpu.memory_space<vmem>>, vector<1x8x256xf32>
    %151 = vector.shape_cast %150 : vector<1x8x256xf32> to vector<8x256xf32>
    %152 = vector.shape_cast %149 : vector<8x256xf32> to vector<1x8x256xf32>
    tpu.vector_store %arg9[%c0_111, %c0_112, %c0_113], %152 {strides = array<i32>} : memref<1x8x512xf32, #tpu.memory_space<vmem>>, vector<1x8x256xf32>,
    %153 = vector.extract_strided_slice %121 {offsets = [0, 256], sizes = [8, 256], strides = [1, 1]} : vector<8x512xf32> to vector<8x256xf32>
    %154 = vector.extract_strided_slice %143 {offsets = [0, 1], sizes = [8, 1], strides = [1, 1]} : vector<8x2xf32> to vector<8x1xf32>
    %155 = vector.broadcast %154 : vector<8x1xf32> to vector<8x256xf32>
    %156 = arith.mulf %153, %155 : vector<8x256xf32>
    %157 = vector.extract_strided_slice %1 {offsets = [0, 256], sizes = [8, 256], strides = [1, 1]} : vector<8x512xf32> to vector<8x256xf32>
    %158 = arith.addf %156, %157 : vector<8x256xf32>
    %c0_114 = arith.constant 0 : index
    %c0_115 = arith.constant 0 : index
    %c256 = arith.constant 256 : index
    %159 = vector.load %arg9[%c0_114, %c0_115, %c256] : memref<1x8x512xf32, #tpu.memory_space<vmem>>, vector<1x8x256xf32>
    %160 = vector.shape_cast %159 : vector<1x8x256xf32> to vector<8x256xf32>
    %161 = vector.shape_cast %158 : vector<8x256xf32> to vector<1x8x256xf32>
    tpu.vector_store %arg9[%c0_114, %c0_115, %c256], %161 {strides = array<i32>} : memref<1x8x512xf32, #tpu.memory_space<vmem>>, vector<1x8x256xf32>,
    return
  }
  func.func @transform_0(%arg0: i32) -> (i32, i32, i32) {
    %c0_i32 = arith.constant 0 : i32
    %c0_i32_0 = arith.constant 0 : i32
    %c0_i32_1 = arith.constant 0 : i32
    return %arg0, %c0_i32, %c0_i32_0 : i32, i32, i32
  }
  func.func @transform_1(%arg0: i32) -> (i32, i32, i32) {
    %c0_i32 = arith.constant 0 : i32
    %c0_i32_0 = arith.constant 0 : i32
    %c0_i32_1 = arith.constant 0 : i32
    %c0_i32_2 = arith.constant 0 : i32
    return %c0_i32, %c0_i32_0, %c0_i32_1 : i32, i32, i32
  }
  func.func @transform_2(%arg0: i32) -> (i32, i32) {
    %c0_i32 = arith.constant 0 : i32
    %c0_i32_0 = arith.constant 0 : i32
    %c0_i32_1 = arith.constant 0 : i32
    return %c0_i32, %c0_i32_0 : i32, i32
  }
  func.func @transform_3(%arg0: i32) -> (i32, i32) {
    %c0_i32 = arith.constant 0 : i32
    %c0_i32_0 = arith.constant 0 : i32
    %c0_i32_1 = arith.constant 0 : i32
    return %c0_i32, %c0_i32_0 : i32, i32
  }
  func.func @transform_4(%arg0: i32) -> (i32, i32) {
    %c0_i32 = arith.constant 0 : i32
    %c0_i32_0 = arith.constant 0 : i32
    %c0_i32_1 = arith.constant 0 : i32
    return %c0_i32, %c0_i32_0 : i32, i32
  }
  func.func @transform_5(%arg0: i32) -> (i32, i32) {
    %c0_i32 = arith.constant 0 : i32
    %c0_i32_0 = arith.constant 0 : i32
    %c0_i32_1 = arith.constant 0 : i32
    return %c0_i32, %c0_i32_0 : i32, i32
  }
  func.func @transform_6(%arg0: i32) -> (i32, i32) {
    %c0_i32 = arith.constant 0 : i32
    %c0_i32_0 = arith.constant 0 : i32
    %c0_i32_1 = arith.constant 0 : i32
    return %c0_i32, %c0_i32_0 : i32, i32
  }
  func.func @transform_7(%arg0: i32) -> (i32, i32) {
    %c0_i32 = arith.constant 0 : i32
    %c0_i32_0 = arith.constant 0 : i32
    %c0_i32_1 = arith.constant 0 : i32
    return %c0_i32, %c0_i32_0 : i32, i32
  }
  func.func @transform_8(%arg0: i32) -> (i32, i32, i32) {
    %c0_i32 = arith.constant 0 : i32
    %c0_i32_0 = arith.constant 0 : i32
    %c0_i32_1 = arith.constant 0 : i32
    return %arg0, %c0_i32, %c0_i32_0 : i32, i32, i32
  }
}

</mosaic_0001>

<bundles_post_ra>
// kernel: tpu_custom_call.1
= control target key start
LH: loop header
LB: loop body
LE: loop exit
PB: predicated region body
PF: predicated region fallthrough
CT: control target
= control target key end

     0   :  { %13 = vsyncpa [#allocation4], 0  ;;  %s2748_s0 = inlined_call_operand.hbm [shape: f32[2,8,512], index: 0, kind: input, shape index: {}]   ;;  %s2749_s1 = inlined_call_operand.hbm [shape: f32[9,1,512], index: 1, kind: input, shape index: {}]   ;;  %s2750_s2 = inlined_call_operand.vmem [shape: f32[8,72], index: 2, kind: input, shape index: {}]   ;;  %s2751_s3 = inlined_call_operand.vmem [shape: f32[8,1], index: 3, kind: input, shape index: {}]   ;;  %s2752_s4 = inlined_call_operand.vmem [shape: f32[8,72], index: 4, kind: input, shape index: {}]   ;;  %s2753_s5 = inlined_call_operand.vmem [shape: f32[8,1], index: 5, kind: input, shape index: {}]   ;;  %s2754_s6 = inlined_call_operand.vmem [shape: f32[2,8], index: 6, kind: input, shape index: {}]   ;;  %s2755_s7 = inlined_call_operand.vmem [shape: f32[8,2], index: 7, kind: input, shape index: {}]   ;;  %s2756_s8 = inlined_call_operand.hbm [shape: f32[2,8,512], index: 8, kind: output, shape index: {}]  }
   0x1   :  { %15 = vsyncpa [#allocation4 + $0x1], 0 }
   0x2   :  { %16 = vsyncpa [#allocation7], 0 }
   0x3   :  { %17 = vsyncpa [#allocation5], 0 }
   0x4   :  { %19 = vsyncpa [#allocation5 + $0x1], 0  ;;  %s2138_s27 = smov 0   ;;  %s2140_s28 = smov 0  }
   0x5   :  { %s2142_s29 = smov 0   ;;  %s2144_s30 = smov 0  }
   0x6 LB: > { %s2159_s9 = sadd.s32 4294967295, %s2074_s30   ;;  %s1760_s10 = sadd.s32 4294967294, %s2074_s30   ;;  %s2074_s30 = sphi %s2144_s30, %s2776_s30   ;;  %s2070_s29 = sphi %s2142_s29, %s2779_s29   ;;  %s2066_s28 = sphi %s2140_s28, %s2778_s28   ;;  %s2062_s27 = sphi %s2138_s27, %s2777_s27  }
   0x7   : > { %p45_p0 = scmp.ne.s32.totalorder %s2066_s28, %s2062_s27  ;;  %p2757_p1 = scmp.eq.s32.totalorder %s2159_s9, 0 }
   0x8   : > { %p222_p3 = scmp.eq.s32.totalorder %s1760_s10, 1  ;;  %p1761_p5 = scmp.ge.s32.totalorder %s2074_s30, 1 }
   0x9   : > { %p2168_p4 = por %p2757_p1, %p45_p0  ;;  %p229_p7 = scmp.lt.s32.totalorder %s2074_s30, 3 }
   0xa   : > { %p2173_p6 = por %p222_p3, %p45_p0  ;;  %s2076_s14 = smov [#allocation6]  }
   0xb   : > { %s2762_s11 = scalar_select %p2168_p4, 1, 0 }
   0xc   : > { %s2763_s12 = scalar_select %p2173_p6, 1, 0 }
   0xd   : > { %p2178_p8 = pnand %p1761_p5, %p229_p7  ;;  %s241_s15 = sshll.u32 %s2076_s14, 4  ;;  %s2182_s15 = int_to_ptr.vmem [resolvable:$true] %s241_s15 }
   0xe   : > { %s2194_s17 = sadd.s32 1, %s2074_s30   ;;  %s32_s18 = sadd.s32 1, %s2070_s29 }
   0xf   : > { %s2764_s13 = scalar_select %p2178_p8, 1, 0 }
  0x10   : > { %p1872_p9 = pneg %p2178_p8  ;;  %2766 = sst [smem:[#allocation12_spill]] %s2194_s17 }
  0x11   : > { %s29_s19 = ssub.s32 %s2074_s30, %s2194_s17  ;;  %s1946_s22 = scalar_lea.hbm %s2749_s1, 576 }
  0x12   : > { %p2189_p11 = pnand %p1872_p9, %p2757_p1  ;;  %p1947_p12 = scmp.ne.s32.totalorder %s2749_s1, %s1946_s22 }
  0x13   : > { %p1953_p5 = scmp.lt.u32.totalorder %s1946_s22, %s2749_s1 }
  0x14   : > { %p1948_p13 = pneg %p2189_p11 }
  0x16   : > { %p1949_p0 = pnand %p1948_p13, %p1947_p12 }
  0x18   : > { %p1950_p3 = pneg %p1949_p0 }
  0x1a   : > { %p1955_p7 = pnand %p1953_p5, %p1950_p3 }
  0x1c   : > { %1958 = shalt.err (!%p1955_p7)
}
  0x1d   : > { %s1959_s10 = scalar_lea.vmem %s2182_s15, 576  ;;  %p1967_p2 = scmp.lt.s32.totalorder %s2182_s15, %s2182_s15 }
  0x1e   : > { %p1960_p9 = scmp.ne.s32.totalorder %s2182_s15, %s1959_s10  ;;  %p1968_p6 = scmp.lt.s32.totalorder %s1959_s10, %s1959_s10 }
  0x20   : > { %p1962_p10 = pnand %p1960_p9, %p1948_p13  ;;  %p1969_p4 = por %p1968_p6, %p1967_p2 }
  0x22   : > { %p1963_p1 = pneg %p1962_p10 }
  0x24   : > { %p1970_p8 = pnand %p1969_p4, %p1963_p1 }
  0x26   : > { %1973 = shalt.err (!%p1970_p8)
}
  0x27   : > { %s2077_s14 = smov 64   ;;  %s2078_s20 = smov 4  }
  0x28   : > { %1875 = dma.hbm_to_vmem [thread:$0]  (!%p2189_p11), %s2749_s1, 576, %s2182_s15, [#allocation7], %s2077_s14, %s2077_s14, %s2078_s20  }
  0x29   : > { %p30_p2 = scmp.eq.s32.totalorder %s29_s19, 0  ;;  %p39_p1 = scmp.ne.s32.totalorder %s2070_s29, %s2066_s28 }
  0x2a   : > { %p40_p4 = scmp.eq.s32.totalorder %s2074_s30, 0  ;;  %p1885_p6 = scmp.lt.s32.totalorder %s2074_s30, 2 }
  0x2b   : > { %s2225_s23 = scalar_select %p30_p2, %s2070_s29, %s32_s18  }
  0x2c   : > { %p41_p8 = por %p40_p4, %p39_p1  ;;  %p2767_p10 = scmp.eq.s32.totalorder %s2159_s9, 1 }
  0x2d   : > { %s273_s25 = sand.u32 1, %s2070_s29   ;;  %s1784_s26 = sshll.u32 %s2074_s30, 9 }
  0x2e   : > { %p2229_p12 = por %p2767_p10, %p39_p1  ;;  %s1764_s10 = sshll.u32 %s273_s25, 5 }
  0x2f   : > { %s2238_s21 = scalar_lea.hbm %s2748_s0, %s1784_s26  ;;  %s277_s15 = scalar_lea.vmem [#allocation3], %s1764_s10 }
  0x30   : > { %s285_s18 = sshll.u32 %s277_s15, 4  ;;  %p2240_p11 = pnand %p1885_p6, %p41_p8  ;;  %s2244_s18 = int_to_ptr.vmem [resolvable:$true] %s285_s18 }
  0x31   : > { %s274_s14 = scalar_lea.sflag [#allocation4], %s273_s25  ;;  %s1974_s20 = scalar_lea.hbm %s2238_s21, 512 }
  0x32   : > { %p1975_p13 = scmp.ne.s32.totalorder %s2238_s21, %s1974_s20  ;;  %p1976_p0 = pneg %p2240_p11 }
  0x33   : > { %s1979_s26 = scalar_lea.hbm %s2748_s0, 1024  ;;  %p1980_p7 = scmp.lt.u32.totalorder %s2238_s21, %s2748_s0 }
  0x34   : > { %p1977_p3 = pnand %p1976_p0, %p1975_p13  ;;  %p1981_p9 = scmp.lt.u32.totalorder %s1979_s26, %s1974_s20 }
  0x35   : > { %p1983_p1 = scmp.lt.u32.totalorder %s1974_s20, %s2238_s21 }
  0x36   : > { %p1978_p5 = pneg %p1977_p3  ;;  %p1982_p2 = por %p1981_p9, %p1980_p7 }
  0x38   : > { %p1984_p4 = por %p1983_p1, %p1982_p2 }
  0x3a   : > { %p1985_p6 = pnand %p1984_p4, %p1978_p5 }
  0x3c   : > { %1988 = shalt.err (!%p1985_p6)
}
  0x3d   : > { %s1989_s25 = scalar_lea.vmem %s2244_s18, 512  ;;  %s2079_s15 = smov [#allocation3]  }
  0x3e   : > { %p1990_p8 = scmp.ne.s32.totalorder %s2244_s18, %s1989_s25  ;;  %s1994_s17 = sshll.u32 %s2079_s15, 4  ;;  %s1995_s17 = int_to_ptr.vmem [resolvable:$false] %s1994_s17 }
  0x3f   : > { %s1996_s22 = scalar_lea.vmem %s1995_s17, 1024  ;;  %p1997_p3 = scmp.lt.s32.totalorder %s2244_s18, %s1995_s17 }
  0x40   : > { %p1992_p10 = pnand %p1990_p8, %p1976_p0  ;;  %p1998_p7 = scmp.lt.s32.totalorder %s1996_s22, %s1989_s25 }
  0x42   : > { %p1993_p13 = pneg %p1992_p10  ;;  %p1999_p9 = por %p1998_p7, %p1997_p3 }
  0x44   : > { %p2000_p2 = pnand %p1999_p9, %p1993_p13 }
  0x46   : > { %2003 = shalt.err (!%p2000_p2)
}
  0x47   : > { %1879 = dma.hbm_to_vmem [thread:$0]  (!%p2240_p11), %s2238_s21, 512, %s2244_s18, %s274_s14  }
  0x48   : > { %p2770_p5 = scmp.ne.s32.totalorder %s2764_s13, 0 }
  0x49   : > { %s2274_s20 = sand.u32 (!%p2770_p5), 1, %s2066_s28   ;;  %p2771_p0 = scmp.ne.s32.totalorder (!%p2770_p5), %s2762_s11, 0 }
  0x4a   : > { %294 = sbr.rel (%p2770_p5) target bundleno = 1629 (0x65d), region = 52  ;;  %s1768_s26 = sshll.u32 (!%p2770_p5), %s2274_s20, 5 }
  0x4b   : > { %s297_s10 = scalar_lea.sflag (!%p2770_p5), [#allocation4], %s2274_s20  ;;  %s2280_s16 = scalar_lea.vmem (!%p2770_p5), [#allocation3], %s1768_s26 }
  0x51   : > { %2049 = dma.done.wait (%p2771_p0), %s297_s10, 512  }
  0x52   : > { %2051 = vsyncadd (%p2771_p0), %s297_s10, 4294966784  ;;  %p2772_p11 = scmp.eq.s32.totalorder %s2159_s9, 0 }
  0x54   : > { %2053 = dma.done.wait (%p2772_p11), [#allocation7], 576   ;;  %p2773_p1 = pmov %p2772_p11 }
  0x55   : > { %v2291_v0 = vld [vmem:[%s2280_s16 + $0x10] sm:$0xff]  ;;  %v2294_v1 = vld [vmem:[%s2280_s16] sm:$0xff]  ;;  %s2080_s13 = smov 17   ;;  %v2301_v2 = vld [vmem:[%s2280_s16 + $0x18] sm:$0xff]  ;;  %s2081_s11 = smov 16   ;;  %v2087_v4 = vmov 0.0   ;;  %v349_v7 = vlaneseq }
  0x56   : > { %2055 = vsyncadd (%p2773_p1), [#allocation7], 4294966720  ;;  %345 = vrot.lane.b32.xlu1 %v2291_v0, %s2080_s13  ;;  %341 = vrot.lane.b32.xlu0 %v2294_v1, %s2080_s13  ;;  %v2304_v3 = vld [vmem:[%s2280_s16 + $0x8] sm:$0xff]  ;;  %s2082_s21 = smov 15   ;;  %s2083_s18 = smov 1   ;;  %v2088_v5 = vmov 0  }
  0x57   : > { %s2084_s19 = smov 127   ;;  %s2085_s14 = smov 113   ;;  %836 = vmatprep.mubr.f32.mxu0 %v2087_v4  ;;  %907 = vmatprep.mubr.f32.mxu1 %v2087_v4  ;;  %v762_v6 = vld [vmem:[%s2751_s3] sm:$0xff]  ;;  %v359_v8 = vshrl.u32 %v349_v7, 7  ;;  %v2371_v11 = vand.u32 127, %v349_v7  ;;  %vm768_vm8 = vcmask 588800  }
  0x58   : > { %s2086_s25 = smov 112   ;;  %1935 = vset.pattern.permute.xlu0 %v2088_v5  ;;  %s2089_s15 = smov 111   ;;  %v356_v13 = vld [vmem:[#allocation6] sm:$0xf]  ;;  %v400_v14 = vld [vmem:[#allocation6 + $0x4] sm:$0xf] }
  0x59   : > { %v2373_v12 = vsub.s32 1, %v359_v8  ;;  %vm351_vm0 = vcmp.lt.s32.totalorder %v2371_v11, 17  ;;  %v2376_v15 = vsub.s32 0, %v359_v8  ;;  %v2378_v16 = vsub.s32 2, %v359_v8  ;;  %v444_v54 = vld [vmem:[#allocation6 + $0x8] sm:$0xf] }
  0x5a   : > { %347 = vrot.lane.b32.xlu1 %v2301_v2, %s2080_s13  ;;  %343 = vrot.lane.b32.xlu0 %v2304_v3, %s2080_s13  ;;  %v2380_v19 = vsub.s32 3, %v359_v8  ;;  %vm394_vm1 = vcmp.lt.s32.totalorder %v2371_v11, 16  ;;  %v488_v55 = vld [vmem:[#allocation6 + $0xc] sm:$0xf]  ;;  %vm438_vm2 = vcmp.lt.s32.totalorder %v2371_v11, 15  ;;  %vm482_vm3 = vcmp.lt.s32.totalorder %v2371_v11, 1 }
  0x5b   : > { %v365_v20 = vrot.slane %v356_v13, %v2373_v12  ;;  %v409_v21 = vrot.slane %v400_v14, %v2373_v12  ;;  %v361_v23 = vrot.slane %v356_v13, %v2376_v15  ;;  %v369_v24 = vrot.slane %v356_v13, %v2378_v16  ;;  %s1785_s22 = sshll.u32 %s2159_s9, 9  ;;  %s336_s10 = scalar_lea.vmem [#allocation8], %s1768_s26 }
  0x5c   : > { %v405_v27 = vrot.slane %v400_v14, %v2376_v15  ;;  %v413_v30 = vrot.slane %v400_v14, %v2378_v16  ;;  %v373_v31 = vrot.slane %v356_v13, %v2380_v19  ;;  %v417_v35 = vrot.slane %v400_v14, %v2380_v19  ;;  %s1680_s17 = sshll.u32 %s336_s10, 4  ;;  %s2704_s9 = scalar_lea.hbm %s2756_s8, %s1785_s22  ;;  %s2706_s17 = int_to_ptr.vmem [resolvable:$true] %s1680_s17 }
  0x5d   : > { %v453_v58 = vrot.slane %v444_v54, %v2373_v12  ;;  %v497_v59 = vrot.slane %v488_v55, %v2373_v12  ;;  %v449_v61 = vrot.slane %v444_v54, %v2376_v15  ;;  %v457_v62 = vrot.slane %v444_v54, %v2378_v16  ;;  %s1666_s26 = scalar_lea.sflag [#allocation5], %s2274_s20 }
  0x5e   : > { %388 = vrot.lane.b32.xlu1 %v2304_v3, %s2081_s11  ;;  %386 = vrot.lane.b32.xlu0 %v2294_v1, %s2081_s11  ;;  %v461_v63 = vrot.slane %v444_v54, %v2380_v19  ;;  %vm557_vm4 = vcmp.lt.s32.totalorder %v2371_v11, 127  ;;  %vm645_vm5 = vcmp.lt.s32.totalorder %v2371_v11, 112  ;;  %vm601_vm6 = vcmp.lt.s32.totalorder %v2371_v11, 113 }
  0x5f   : > { %vm689_vm7 = vcmp.lt.s32.totalorder %v2371_v11, 111  ;;  %vm2090_vm9 = vmmov 0   ;;  %vm1481_vm10 = vcmask 7168   ;;  %vm1484_vm11 = vcmask 64512  }
  0x60   : > { %vm1564_vm12 = vcmask 1041408   ;;  %vm1560_vm13 = vcmask 15360  }
  0x62   : > { %392 = vrot.lane.b32.xlu1 %v2301_v2, %s2081_s11  ;;  %390 = vrot.lane.b32.xlu0 %v2291_v0, %s2081_s11 }
  0x66   : > { %432 = vrot.lane.b32.xlu1 %v2304_v3, %s2082_s21  ;;  %430 = vrot.lane.b32.xlu0 %v2294_v1, %s2082_s21 }
  0x6a   : > { %436 = vrot.lane.b32.xlu1 %v2301_v2, %s2082_s21  ;;  %434 = vrot.lane.b32.xlu0 %v2291_v0, %s2082_s21 }
  0x6e   : > { %476 = vrot.lane.b32.xlu1 %v2304_v3, %s2083_s18  ;;  %474 = vrot.lane.b32.xlu0 %v2294_v1, %s2083_s18 }
  0x72   : > { %480 = vrot.lane.b32.xlu1 %v2301_v2, %s2083_s18  ;;  %478 = vrot.lane.b32.xlu0 %v2291_v0, %s2083_s18 }
  0x76   : > { %551 = vrot.lane.b32.xlu1 %v2304_v3, %s2084_s19  ;;  %549 = vrot.lane.b32.xlu0 %v2294_v1, %s2084_s19 }
  0x7a   : > { %555 = vrot.lane.b32.xlu1 %v2301_v2, %s2084_s19  ;;  %553 = vrot.lane.b32.xlu0 %v2291_v0, %s2084_s19 }
  0x7e   : > { %595 = vrot.lane.b32.xlu1 %v2304_v3, %s2085_s14  ;;  %593 = vrot.lane.b32.xlu0 %v2294_v1, %s2085_s14 }
  0x82   : > { %599 = vrot.lane.b32.xlu1 %v2301_v2, %s2085_s14  ;;  %597 = vrot.lane.b32.xlu0 %v2291_v0, %s2085_s14 }
  0x86   : > { %639 = vrot.lane.b32.xlu1 %v2304_v3, %s2086_s25  ;;  %637 = vrot.lane.b32.xlu0 %v2294_v1, %s2086_s25 }
  0x8a   : > { %643 = vrot.lane.b32.xlu1 %v2301_v2, %s2086_s25  ;;  %641 = vrot.lane.b32.xlu0 %v2291_v0, %s2086_s25 }
  0x8e   : > { %683 = vrot.lane.b32.xlu1 %v2304_v3, %s2089_s15  ;;  %681 = vrot.lane.b32.xlu0 %v2294_v1, %s2089_s15 }
  0x92   : > { %687 = vrot.lane.b32.xlu1 %v2301_v2, %s2089_s15  ;;  %685 = vrot.lane.b32.xlu0 %v2291_v0, %s2089_s15 }
  0x96   : > { %765 = vperm.xlu0 %1935, %v762_v6  }
  0xc8   : > { %v346_v9 = vpop.permute.xlu1 %345  ;;  %v342_v10 = vpop.permute.xlu0 %341 }
  0xcc   : > { %v348_v17 = vpop.permute.xlu1 %347  ;;  %v344_v18 = vpop.permute.xlu0 %343 }
  0xcd   : > { %v354_v22 = vsel %vm351_vm0, %v342_v10, %v344_v18  ;;  %v355_v28 = vsel %vm351_vm0, %v348_v17, %v342_v10  ;;  %v353_v32 = vsel %vm351_vm0, %v344_v18, %v346_v9  ;;  %v352_v36 = vsel %vm351_vm0, %v346_v9, %v348_v17 }
  0xce   : > { %v379_v33 = vmul.f32 %v365_v20, %v354_v22  ;;  %v378_v37 = vmul.f32 %v361_v23, %v355_v28  ;;  %v380_v41 = vmul.f32 %v369_v24, %v353_v32  ;;  %v381_v47 = vmul.f32 %v373_v31, %v352_v36 }
  0xcf   : > { %v493_v9 = vrot.slane %v488_v55, %v2376_v15  ;;  %v501_v10 = vrot.slane %v488_v55, %v2378_v16  ;;  %v505_v18 = vrot.slane %v488_v55, %v2380_v19 }
  0xd0   : > { %v389_v25 = vpop.permute.xlu1 %388  ;;  %v387_v26 = vpop.permute.xlu0 %386 }
  0xd1   : > { %v397_v29 = vsel %vm394_vm1, %v387_v26, %v389_v25 }
  0xd2   : > { %v423_v34 = vmul.f32 %v409_v21, %v397_v29 }
  0xd4   : > { %v393_v38 = vpop.permute.xlu1 %392  ;;  %v391_v39 = vpop.permute.xlu0 %390  ;;  %v1800_v40 = vpack.c.bf16 %v423_v34, %v379_v33  ;;  %v563_v34 = vld [vmem:[#allocation6 + $0x14] sm:$0xf] }
  0xd5   : > { %v398_v42 = vsel %vm394_vm1, %v393_v38, %v387_v26  ;;  %v395_v43 = vsel %vm394_vm1, %v391_v39, %v393_v38  ;;  %v396_v44 = vsel %vm394_vm1, %v389_v25, %v391_v39  ;;  %v519_v25 = vld [vmem:[#allocation6 + $0x10] sm:$0xf] }
  0xd6   : > { %v422_v45 = vmul.f32 %v405_v27, %v398_v42  ;;  %v424_v46 = vmul.f32 %v413_v30, %v396_v44  ;;  %1801 = vmatprep.subr.bf16.mxu0 %v1800_v40  ;;  %v425_v48 = vmul.f32 %v417_v35, %v395_v43  ;;  %v528_v35 = vrot.slane %v519_v25, %v2373_v12 }
  0xd7   : > { %v536_v36 = vrot.slane %v519_v25, %v2380_v19  ;;  %v532_v43 = vrot.slane %v519_v25, %v2378_v16  ;;  %v568_v44 = vrot.slane %v563_v34, %v2376_v15 }
  0xd8   : > { %v433_v49 = vpop.permute.xlu1 %432  ;;  %v431_v50 = vpop.permute.xlu0 %430  ;;  %v1802_v51 = vpack.c.bf16 %v422_v45, %v378_v37  ;;  %v1816_v52 = vpack.c.bf16 %v425_v48, %v381_v47  ;;  %v1818_v53 = vpack.c.bf16 %v424_v46, %v380_v41  ;;  %v524_v37 = vrot.slane %v519_v25, %v2376_v15 }
  0xd9   : > { %v441_v60 = vsel %vm438_vm2, %v431_v50, %v433_v49  ;;  %v580_v45 = vrot.slane %v563_v34, %v2380_v19  ;;  %v572_v47 = vrot.slane %v563_v34, %v2373_v12  ;;  %v576_v48 = vrot.slane %v563_v34, %v2378_v16 }
  0xda   : > { %1803 = vmatpush1.bf16.msra.mxu0 %v1802_v51  ;;  %1817 = vmatprep.subr.bf16.mxu1 %v1816_v52  ;;  %v467_v13 = vmul.f32 %v453_v58, %v441_v60  ;;  %v542_v51 = vmul.f32 %v528_v35, %v2304_v3  ;;  %v544_v52 = vmul.f32 %v536_v36, %v2301_v2 }
  0xdb   : > { %1819 = vmatpush1.bf16.msra.mxu1 %v1818_v53  ;;  %v541_v53 = vmul.f32 %v524_v37, %v2294_v1  ;;  %v543_v54 = vmul.f32 %v532_v43, %v2291_v0  ;;  %v695_v43 = vld [vmem:[#allocation6 + $0x20] sm:$0xf] }
  0xdc   : > { %v437_v56 = vpop.permute.xlu1 %436  ;;  %v435_v57 = vpop.permute.xlu0 %434 }
  0xdd   : > { %v442_v7 = vsel %vm438_vm2, %v437_v56, %v431_v50  ;;  %v440_v14 = vsel %vm438_vm2, %v433_v49, %v435_v57  ;;  %v439_v20 = vsel %vm438_vm2, %v435_v57, %v437_v56 }
  0xde   : > { %v466_v21 = vmul.f32 %v449_v61, %v442_v7  ;;  %v468_v26 = vmul.f32 %v457_v62, %v440_v14  ;;  %v469_v30 = vmul.f32 %v461_v63, %v439_v20  ;;  %v651_v7 = vld [vmem:[#allocation6 + $0x1c] sm:$0xf] }
  0xdf   : > { %v664_v25 = vrot.slane %v651_v7, %v2378_v16 }
  0xe0   : > { %v477_v5 = vpop.permute.xlu1 %476  ;;  %v475_v6 = vpop.permute.xlu0 %474 }
  0xe1   : > { %v485_v8 = vsel %vm482_vm3, %v475_v6, %v477_v5 }
  0xe2   : > { %v511_v17 = vmul.f32 %v497_v59, %v485_v8  ;;  %v607_v8 = vld [vmem:[#allocation6 + $0x18] sm:$0xf] }
  0xe4   : > { %v481_v22 = vpop.permute.xlu1 %480  ;;  %v479_v23 = vpop.permute.xlu0 %478  ;;  %v1804_v24 = vpack.c.bf16 %v511_v17, %v467_v13 }
  0xe5   : > { %v486_v27 = vsel %vm482_vm3, %v481_v22, %v475_v6  ;;  %v483_v28 = vsel %vm482_vm3, %v479_v23, %v481_v22  ;;  %v484_v29 = vsel %vm482_vm3, %v477_v5, %v479_v23  ;;  %v668_v23 = vrot.slane %v651_v7, %v2380_v19 }
  0xe6   : > { %v510_v31 = vmul.f32 %v493_v9, %v486_v27  ;;  %v512_v32 = vmul.f32 %v501_v10, %v484_v29  ;;  %v513_v33 = vmul.f32 %v505_v18, %v483_v28  ;;  %1805 = vmatprep.subr.bf16.mxu0 %v1804_v24  ;;  %v624_v9 = vrot.slane %v607_v8, %v2380_v19 }
  0xe7   : > { %v616_v10 = vrot.slane %v607_v8, %v2373_v12  ;;  %v620_v18 = vrot.slane %v607_v8, %v2378_v16  ;;  %v660_v24 = vrot.slane %v651_v7, %v2373_v12 }
  0xe8   : > { %v552_v38 = vpop.permute.xlu1 %551  ;;  %v550_v39 = vpop.permute.xlu0 %549  ;;  %v1806_v40 = vpack.c.bf16 %v510_v31, %v466_v21  ;;  %v1820_v41 = vpack.c.bf16 %v513_v33, %v469_v30  ;;  %v1822_v42 = vpack.c.bf16 %v512_v32, %v468_v26  ;;  %v656_v21 = vrot.slane %v651_v7, %v2376_v15 }
  0xe9   : > { %v560_v46 = vsel %vm557_vm4, %v550_v39, %v552_v38  ;;  %v612_v26 = vrot.slane %v607_v8, %v2376_v15 }
  0xea   : > { %1807 = vmatpush1.bf16.msra.mxu0 %v1806_v40  ;;  %1821 = vmatprep.subr.bf16.mxu1 %v1820_v41  ;;  %v585_v55 = vmul.f32 %v568_v44, %v560_v46 }
  0xeb   : > { %1823 = vmatpush1.bf16.msra.mxu1 %v1822_v42 }
  0xec   : > { %v556_v49 = vpop.permute.xlu1 %555  ;;  %v554_v50 = vpop.permute.xlu0 %553  ;;  %v1810_v5 = vpack.c.bf16 %v585_v55, %v541_v53 }
  0xed   : > { %v561_v56 = vsel %vm557_vm4, %v556_v49, %v550_v39  ;;  %v558_v57 = vsel %vm557_vm4, %v554_v50, %v556_v49  ;;  %v559_v58 = vsel %vm557_vm4, %v552_v38, %v554_v50  ;;  %v712_v49 = vrot.slane %v695_v43, %v2380_v19 }
  0xee   : > { %v588_v59 = vmul.f32 %v580_v45, %v561_v56  ;;  %v586_v60 = vmul.f32 %v572_v47, %v559_v58  ;;  %v587_v61 = vmul.f32 %v576_v48, %v558_v57  ;;  %v704_v50 = vrot.slane %v695_v43, %v2373_v12 }
  0xf0   : > { %v596_v3 = vpop.permute.xlu1 %595  ;;  %v594_v62 = vpop.permute.xlu0 %593  ;;  %v1808_v2 = vpack.c.bf16 %v586_v60, %v542_v51  ;;  %v1824_v63 = vpack.c.bf16 %v588_v59, %v544_v52  ;;  %v1826_v1 = vpack.c.bf16 %v587_v61, %v543_v54  ;;  %v708_v51 = vrot.slane %v695_v43, %v2378_v16 }
  0xf1   : > { %v604_v28 = vsel %vm601_vm6, %v594_v62, %v596_v3  ;;  %v700_v52 = vrot.slane %v695_v43, %v2376_v15 }
  0xf2   : > { %1809 = vmatprep.subr.bf16.mxu0 %v1808_v2  ;;  %1825 = vmatprep.subr.bf16.mxu1 %v1824_v63  ;;  %v629_v41 = vmul.f32 %v612_v26, %v604_v28 }
  0xf3   : > { %1811 = vmatpush1.bf16.msra.mxu0 %v1810_v5  ;;  %1827 = vmatpush1.bf16.msra.mxu1 %v1826_v1 }
  0xf4   : > { %v600_v0 = vpop.permute.xlu1 %599  ;;  %v598_v6 = vpop.permute.xlu0 %597 }
  0xf5   : > { %v605_v17 = vsel %vm601_vm6, %v600_v0, %v594_v62  ;;  %v603_v20 = vsel %vm601_vm6, %v596_v3, %v598_v6  ;;  %v602_v27 = vsel %vm601_vm6, %v598_v6, %v600_v0  ;;  %v725_v62 = vld [vmem:[%s2750_s2] sm:$0xff] }
  0xf6   : > { %v632_v29 = vmul.f32 %v624_v9, %v605_v17  ;;  %v630_v30 = vmul.f32 %v616_v10, %v603_v20  ;;  %v631_v37 = vmul.f32 %v620_v18, %v602_v27  ;;  %v1321_v18 = vld [vmem:[%s2753_s5] sm:$0xff] }
  0xf8   : > { %v640_v13 = vpop.permute.xlu1 %639  ;;  %v638_v14 = vpop.permute.xlu0 %637 }
  0xf9   : > { %v648_v22 = vsel %vm645_vm5, %v638_v14, %v640_v13 }
  0xfa   : > { %v673_v33 = vmul.f32 %v656_v21, %v648_v22 }
  0xfc   : > { %v644_v31 = vpop.permute.xlu1 %643  ;;  %v642_v32 = vpop.permute.xlu0 %641  ;;  %v1814_v48 = vpack.c.bf16 %v673_v33, %v629_v41 }
  0xfd   : > { %v649_v34 = vsel %vm645_vm5, %v644_v31, %v638_v14  ;;  %v646_v35 = vsel %vm645_vm5, %v642_v32, %v644_v31  ;;  %v647_v36 = vsel %vm645_vm5, %v640_v13, %v642_v32 }
  0xfe   : > { %v676_v38 = vmul.f32 %v668_v23, %v649_v34  ;;  %v674_v39 = vmul.f32 %v660_v24, %v647_v36  ;;  %v675_v40 = vmul.f32 %v664_v25, %v646_v35  ;;  %v930_v24 = vld [vmem:[#allocation6] sm:$0xf]  ;;  %v972_v25 = vld [vmem:[#allocation6 + $0x4] sm:$0xf] }
  0xff   : > { %v939_v28 = vrot.slane %v930_v24, %v2373_v12  ;;  %v935_v31 = vrot.slane %v930_v24, %v2376_v15  ;;  %v947_v34 = vrot.slane %v930_v24, %v2380_v19  ;;  %v985_v35 = vrot.slane %v972_v25, %v2378_v16 }
 0x100   : > { %v684_v42 = vpop.permute.xlu1 %683  ;;  %v682_v44 = vpop.permute.xlu0 %681  ;;  %v1812_v45 = vpack.c.bf16 %v674_v39, %v630_v30  ;;  %v1828_v46 = vpack.c.bf16 %v676_v38, %v632_v29  ;;  %v1830_v47 = vpack.c.bf16 %v675_v40, %v631_v37  ;;  %v981_v29 = vrot.slane %v972_v25, %v2373_v12 }
 0x101   : > { %v692_v53 = vsel %vm689_vm7, %v682_v44, %v684_v42  ;;  %v977_v37 = vrot.slane %v972_v25, %v2376_v15  ;;  %v989_v41 = vrot.slane %v972_v25, %v2380_v19 }
 0x102   : > { %1813 = vmatprep.subr.bf16.mxu0 %v1812_v45  ;;  %1829 = vmatprep.subr.bf16.mxu1 %v1828_v46  ;;  %v717_v3 = vmul.f32 %v700_v52, %v692_v53 }
 0x103   : > { %1815 = vmatpush1.bf16.msra.mxu0 %v1814_v48  ;;  %1831 = vmatpush1.bf16.msra.mxu1 %v1830_v47 }
 0x104   : > { %v688_v54 = vpop.permute.xlu1 %687  ;;  %v686_v55 = vpop.permute.xlu0 %685 }
 0x105   : > { %v693_v56 = vsel %vm689_vm7, %v688_v54, %v682_v44  ;;  %v690_v57 = vsel %vm689_vm7, %v686_v55, %v688_v54  ;;  %v691_v58 = vsel %vm689_vm7, %v684_v42, %v686_v55  ;;  %v943_v42 = vrot.slane %v930_v24, %v2378_v16 }
 0x106   : > { %v720_v59 = vmul.f32 %v712_v49, %v693_v56  ;;  %v718_v60 = vmul.f32 %v704_v50, %v691_v58  ;;  %v719_v61 = vmul.f32 %v708_v51, %v690_v57 }
 0x108   : > { %788 = vmatprep.subr.mxu0 %v718_v60  ;;  %859 = vmatprep.subr.mxu1 %v720_v59 }
 0x109   : > { %789 = vmatpush1.msra.mxu0 %v717_v3  ;;  %860 = vmatpush1.msra.mxu1 %v719_v61  ;;  %v1014_v3 = vld [vmem:[#allocation6 + $0x8] sm:$0xf] }
 0x10a   : > { %1771 = vmatmul.mubr.msk.f32.vlgmr.msra.gmra.mrb[0].mxu0 %vm768_vm8, %v725_v62  ;;  %1772 = vmatmul.mubr.msk.f32.vlgmr.msra.gmra.mrb[0].mxu1 %vm768_vm8, %v725_v62  ;;  %v1056_v62 = vld [vmem:[#allocation6 + $0xc] sm:$0xf] }
 0x10b   : > { %1394 = vmatprep.mubr.f32.mxu0 %v2087_v4  ;;  %1465 = vmatprep.mubr.f32.mxu1 %v2087_v4 }
 0x115   : > { %v766_v2 = vpop.permute.xlu0 %765 }
 0x1dd   : > { %v909_v63 = vpop.f32.mrb[0].mxu1  ;;  %v838_v1 = vpop.f32.mrb[0].mxu0 }
 0x1de   : > { %v910_v5 = vadd.f32 %v909_v63, %v766_v2  ;;  %v839_v0 = vadd.f32 %v838_v1, %v766_v2  ;;  %v840_v6 = vpop.f32.mrb[1].mxu0  ;;  %v911_v7 = vpop.f32.mrb[1].mxu1  ;;  %v1023_v1 = vrot.slane %v1014_v3, %v2373_v12 }
 0x1df   : > { %v841_v10 = vadd.f32 %v840_v6, %v766_v2  ;;  %v912_v14 = vadd.f32 %v911_v7, %v766_v2  ;;  %v1019_v6 = vrot.slane %v1014_v3, %v2376_v15 }
 0x1e0   : > { %v2500_v8 = vmax.f32 %v910_v5, 0.0  ;;  %v2502_v9 = vmax.f32 %v839_v0, 0.0  ;;  %v1065_v5 = vrot.slane %v1056_v62, %v2373_v12 }
 0x1e1   : > { %v2508_v13 = vmax.f32 %v841_v10, 0.0  ;;  %v2514_v17 = vmax.f32 %v912_v14, 0.0  ;;  %v1086_v14 = vld [vmem:[#allocation6 + $0x10] sm:$0xf] }
 0x1e2   : > { %922 = vrot.lane.b32.xlu0 %v2500_v8, %s2080_s13  ;;  %918 = vrot.lane.b32.xlu1 %v2502_v9, %s2080_s13 }
 0x1e6   : > { %960 = vrot.lane.b32.xlu0 %v2502_v9, %s2081_s11  ;;  %920 = vrot.lane.b32.xlu1 %v2508_v13, %s2080_s13 }
 0x1ea   : > { %964 = vrot.lane.b32.xlu0 %v2500_v8, %s2081_s11  ;;  %924 = vrot.lane.b32.xlu1 %v2514_v17, %s2080_s13 }
 0x1ee   : > { %1002 = vrot.lane.b32.xlu0 %v2502_v9, %s2082_s21  ;;  %962 = vrot.lane.b32.xlu1 %v2508_v13, %s2081_s11 }
 0x1f2   : > { %1006 = vrot.lane.b32.xlu0 %v2500_v8, %s2082_s21  ;;  %966 = vrot.lane.b32.xlu1 %v2514_v17, %s2081_s11 }
 0x1f6   : > { %1044 = vrot.lane.b32.xlu0 %v2502_v9, %s2083_s18  ;;  %1004 = vrot.lane.b32.xlu1 %v2508_v13, %s2082_s21 }
 0x1fa   : > { %1048 = vrot.lane.b32.xlu0 %v2500_v8, %s2083_s18  ;;  %1008 = vrot.lane.b32.xlu1 %v2514_v17, %s2082_s21  ;;  %s2004_s21 = scalar_lea.vmem %s2706_s17, 512 }
 0x1fb   : > { %p2005_p4 = scmp.ne.s32.totalorder %s2706_s17, %s2004_s21 }
 0x1fd   : > { %p2006_p6 = pnand %p2005_p4, %p2229_p12 }
 0x1fe   : > { %1116 = vrot.lane.b32.xlu0 %v2502_v9, %s2084_s19  ;;  %1046 = vrot.lane.b32.xlu1 %v2508_v13, %s2083_s18 }
 0x1ff   : > { %p2007_p8 = pneg %p2006_p6 }
 0x202   : > { %1120 = vrot.lane.b32.xlu0 %v2500_v8, %s2084_s19  ;;  %1050 = vrot.lane.b32.xlu1 %v2514_v17, %s2083_s18 }
 0x206   : > { %1158 = vrot.lane.b32.xlu0 %v2502_v9, %s2085_s14  ;;  %1118 = vrot.lane.b32.xlu1 %v2508_v13, %s2084_s19 }
 0x20a   : > { %1162 = vrot.lane.b32.xlu0 %v2500_v8, %s2085_s14  ;;  %1122 = vrot.lane.b32.xlu1 %v2514_v17, %s2084_s19 }
 0x20e   : > { %1200 = vrot.lane.b32.xlu0 %v2502_v9, %s2086_s25  ;;  %1160 = vrot.lane.b32.xlu1 %v2508_v13, %s2085_s14 }
 0x212   : > { %1204 = vrot.lane.b32.xlu0 %v2500_v8, %s2086_s25  ;;  %1164 = vrot.lane.b32.xlu1 %v2514_v17, %s2085_s14 }
 0x216   : > { %1242 = vrot.lane.b32.xlu0 %v2502_v9, %s2089_s15  ;;  %1202 = vrot.lane.b32.xlu1 %v2508_v13, %s2086_s25 }
 0x21a   : > { %1246 = vrot.lane.b32.xlu0 %v2500_v8, %s2089_s15  ;;  %1206 = vrot.lane.b32.xlu1 %v2514_v17, %s2086_s25 }
 0x21e   : > { %1324 = vperm.xlu0 %1935, %v1321_v18   ;;  %1244 = vrot.lane.b32.xlu1 %v2508_v13, %s2089_s15  ;;  %v1031_v18 = vrot.slane %v1014_v3, %v2380_v19 }
 0x222   : > { %1248 = vrot.lane.b32.xlu1 %v2514_v17, %s2089_s15 }
 0x254   : > { %v923_v20 = vpop.permute.xlu0 %922  ;;  %v919_v21 = vpop.permute.xlu1 %918 }
 0x258   : > { %v961_v22 = vpop.permute.xlu0 %960  ;;  %v921_v23 = vpop.permute.xlu1 %920 }
 0x259   : > { %v928_v30 = vsel %vm351_vm0, %v919_v21, %v921_v23  ;;  %v927_v45 = vsel %vm351_vm0, %v921_v23, %v923_v20  ;;  %v1128_v23 = vld [vmem:[#allocation6 + $0x14] sm:$0xf] }
 0x25a   : > { %v953_v38 = vmul.f32 %v939_v28, %v928_v30  ;;  %v954_v56 = vmul.f32 %v943_v42, %v927_v45  ;;  %v1027_v28 = vrot.slane %v1014_v3, %v2378_v16 }
 0x25c   : > { %v965_v26 = vpop.permute.xlu0 %964  ;;  %v925_v27 = vpop.permute.xlu1 %924 }
 0x25d   : > { %v926_v43 = vsel %vm351_vm0, %v923_v20, %v925_v27  ;;  %v929_v44 = vsel %vm351_vm0, %v925_v27, %v919_v21  ;;  %v1069_v20 = vrot.slane %v1056_v62, %v2378_v16  ;;  %v1073_v27 = vrot.slane %v1056_v62, %v2380_v19 }
 0x25e   : > { %v952_v52 = vmul.f32 %v935_v31, %v929_v44  ;;  %v955_v53 = vmul.f32 %v947_v34, %v926_v43  ;;  %v1091_v31 = vrot.slane %v1086_v14, %v2376_v15 }
 0x260   : > { %v1003_v32 = vpop.permute.xlu0 %1002  ;;  %v963_v33 = vpop.permute.xlu1 %962 }
 0x261   : > { %v970_v36 = vsel %vm394_vm1, %v961_v22, %v963_v33  ;;  %v969_v39 = vsel %vm394_vm1, %v963_v33, %v965_v26 }
 0x262   : > { %v995_v40 = vmul.f32 %v981_v29, %v970_v36  ;;  %v996_v49 = vmul.f32 %v985_v35, %v969_v39 }
 0x264   : > { %v1007_v46 = vpop.permute.xlu0 %1006  ;;  %v967_v47 = vpop.permute.xlu1 %966  ;;  %v1832_v48 = vpack.c.bf16 %v995_v40, %v953_v38  ;;  %v1850_v61 = vpack.c.bf16 %v996_v49, %v954_v56  ;;  %v1095_v38 = vrot.slane %v1086_v14, %v2373_v12 }
 0x265   : > { %v968_v50 = vsel %vm394_vm1, %v965_v26, %v967_v47  ;;  %v971_v51 = vsel %vm394_vm1, %v967_v47, %v961_v22  ;;  %v1061_v22 = vrot.slane %v1056_v62, %v2376_v15  ;;  %v1099_v47 = vrot.slane %v1086_v14, %v2378_v16 }
 0x266   : > { %v994_v54 = vmul.f32 %v977_v37, %v971_v51  ;;  %v997_v55 = vmul.f32 %v989_v41, %v968_v50  ;;  %1833 = vmatprep.subr.bf16.mxu0 %v1832_v48  ;;  %v1133_v37 = vrot.slane %v1128_v23, %v2376_v15  ;;  %v1103_v48 = vrot.slane %v1086_v14, %v2380_v19 }
 0x268   : > { %v1834_v57 = vpack.c.bf16 %v994_v54, %v952_v52  ;;  %v1045_v58 = vpop.permute.xlu0 %1044  ;;  %v1005_v59 = vpop.permute.xlu1 %1004  ;;  %v1848_v60 = vpack.c.bf16 %v997_v55, %v955_v53  ;;  %v1108_v52 = vmul.f32 %v1091_v31, %v2502_v9  ;;  %v1109_v54 = vmul.f32 %v1095_v38, %v2508_v13 }
 0x269   : > { %v1012_v0 = vsel %vm438_vm2, %v1003_v32, %v1005_v59  ;;  %v1011_v33 = vsel %vm438_vm2, %v1005_v59, %v1007_v46 }
 0x26a   : > { %1835 = vmatpush1.bf16.msra.mxu0 %v1834_v57  ;;  %1849 = vmatprep.subr.bf16.mxu1 %v1848_v60  ;;  %v1037_v24 = vmul.f32 %v1023_v1, %v1012_v0  ;;  %v1110_v1 = vmul.f32 %v1099_v47, %v2500_v8 }
 0x26b   : > { %1851 = vmatpush1.bf16.msra.mxu1 %v1850_v61  ;;  %v1145_v61 = vrot.slane %v1128_v23, %v2380_v19 }
 0x26c   : > { %v1049_v2 = vpop.permute.xlu0 %1048  ;;  %v1009_v63 = vpop.permute.xlu1 %1008 }
 0x26d   : > { %v1010_v29 = vsel %vm438_vm2, %v1007_v46, %v1009_v63  ;;  %v1013_v30 = vsel %vm438_vm2, %v1009_v63, %v1003_v32  ;;  %v1137_v32 = vrot.slane %v1128_v23, %v2373_v12  ;;  %v1038_v46 = vmul.f32 %v1027_v28, %v1011_v33 }
 0x26e   : > { %v1036_v42 = vmul.f32 %v1019_v6, %v1013_v30  ;;  %v1039_v43 = vmul.f32 %v1031_v18, %v1010_v29  ;;  %v1111_v6 = vmul.f32 %v1103_v48, %v2514_v17 }
 0x270   : > { %v1117_v7 = vpop.permute.xlu0 %1116  ;;  %v1047_v10 = vpop.permute.xlu1 %1046 }
 0x271   : > { %v1054_v21 = vsel %vm482_vm3, %v1045_v58, %v1047_v10  ;;  %v1053_v25 = vsel %vm482_vm3, %v1047_v10, %v1049_v2 }
 0x272   : > { %v1079_v26 = vmul.f32 %v1065_v5, %v1054_v21  ;;  %v1080_v39 = vmul.f32 %v1069_v20, %v1053_v25  ;;  %v1170_v21 = vld [vmem:[#allocation6 + $0x18] sm:$0xf] }
 0x273   : > { %v1179_v8 = vrot.slane %v1170_v21, %v2373_v12  ;;  %v1183_v28 = vrot.slane %v1170_v21, %v2378_v16  ;;  %v1187_v29 = vrot.slane %v1170_v21, %v2380_v19 }
 0x274   : > { %v1121_v34 = vpop.permute.xlu0 %1120  ;;  %v1051_v35 = vpop.permute.xlu1 %1050  ;;  %v1836_v36 = vpack.c.bf16 %v1079_v26, %v1037_v24  ;;  %v1854_v55 = vpack.c.bf16 %v1080_v39, %v1038_v46 }
 0x275   : > { %v1052_v40 = vsel %vm482_vm3, %v1049_v2, %v1051_v35  ;;  %v1055_v41 = vsel %vm482_vm3, %v1051_v35, %v1045_v58  ;;  %v1141_v58 = vrot.slane %v1128_v23, %v2378_v16 }
 0x276   : > { %v1078_v44 = vmul.f32 %v1061_v22, %v1055_v41  ;;  %v1081_v45 = vmul.f32 %v1073_v27, %v1052_v40  ;;  %1837 = vmatprep.subr.bf16.mxu0 %v1836_v36  ;;  %v1212_v22 = vld [vmem:[#allocation6 + $0x1c] sm:$0xf]  ;;  %v1254_v41 = vld [vmem:[#allocation6 + $0x20] sm:$0xf] }
 0x277   : > { %v1217_v25 = vrot.slane %v1212_v22, %v2376_v15  ;;  %v1221_v26 = vrot.slane %v1212_v22, %v2373_v12  ;;  %v1229_v35 = vrot.slane %v1212_v22, %v2380_v19  ;;  %v1259_v48 = vrot.slane %v1254_v41, %v2376_v15 }
 0x278   : > { %v1838_v49 = vpack.c.bf16 %v1078_v44, %v1036_v42  ;;  %v1159_v50 = vpop.permute.xlu0 %1158  ;;  %v1119_v51 = vpop.permute.xlu1 %1118  ;;  %v1852_v53 = vpack.c.bf16 %v1081_v45, %v1039_v43 }
 0x279   : > { %v1125_v56 = vsel %vm557_vm4, %v1119_v51, %v1121_v34  ;;  %v1126_v57 = vsel %vm557_vm4, %v1117_v7, %v1119_v51 }
 0x27a   : > { %v1150_v59 = vmul.f32 %v1133_v37, %v1126_v57  ;;  %v1151_v60 = vmul.f32 %v1137_v32, %v1125_v56  ;;  %1839 = vmatpush1.bf16.msra.mxu0 %v1838_v49  ;;  %1853 = vmatprep.subr.bf16.mxu1 %v1852_v53  ;;  %v1263_v49 = vrot.slane %v1254_v41, %v2373_v12 }
 0x27b   : > { %1855 = vmatpush1.bf16.msra.mxu1 %v1854_v55  ;;  %v1267_v12 = vrot.slane %v1254_v41, %v2378_v16 }
 0x27c   : > { %v1842_v9 = vpack.c.bf16 %v1150_v59, %v1108_v52  ;;  %v1163_v3 = vpop.permute.xlu0 %1162  ;;  %v1123_v62 = vpop.permute.xlu1 %1122  ;;  %v1840_v13 = vpack.c.bf16 %v1151_v60, %v1109_v54 }
 0x27d   : > { %v1124_v2 = vsel %vm557_vm4, %v1121_v34, %v1123_v62  ;;  %v1127_v63 = vsel %vm557_vm4, %v1123_v62, %v1117_v7  ;;  %v1175_v7 = vrot.slane %v1170_v21, %v2376_v15  ;;  %v1225_v34 = vrot.slane %v1212_v22, %v2378_v16 }
 0x27e   : > { %v1152_v5 = vmul.f32 %v1141_v58, %v1124_v2  ;;  %v1153_v0 = vmul.f32 %v1145_v61, %v1127_v63  ;;  %1841 = vmatprep.subr.bf16.mxu0 %v1840_v13  ;;  %v1271_v61 = vrot.slane %v1254_v41, %v2380_v19  ;;  %v1942_v41 = vld [vmem:[%s2280_s16 + $0x10] sm:$0xff] }
 0x27f   : > { %1843 = vmatpush1.bf16.msra.mxu0 %v1842_v9  ;;  %v1284_v9 = vld [vmem:[%s2752_s4] sm:$0xff] }
 0x280   : > { %v1858_v10 = vpack.c.bf16 %v1152_v5, %v1110_v1  ;;  %v1201_v14 = vpop.permute.xlu0 %1200  ;;  %v1161_v18 = vpop.permute.xlu1 %1160  ;;  %v1856_v20 = vpack.c.bf16 %v1153_v0, %v1111_v6 }
 0x281   : > { %v1167_v17 = vsel %vm601_vm6, %v1161_v18, %v1163_v3  ;;  %v1168_v27 = vsel %vm601_vm6, %v1159_v50, %v1161_v18 }
 0x282   : > { %1857 = vmatprep.subr.bf16.mxu1 %v1856_v20  ;;  %v1192_v36 = vmul.f32 %v1175_v7, %v1168_v27  ;;  %v1193_v37 = vmul.f32 %v1179_v8, %v1167_v17  ;;  %v1483_v7 = vld [vmem:[%s2754_s6] sm:$0x3]  ;;  %v2091_v27 = vmov 1  }
 0x283   : > { %1859 = vmatpush1.bf16.msra.mxu1 %v1858_v10  ;;  %1936 = vset.pattern.permute.xlu1 %v2091_v27 }
 0x284   : > { %v1205_v23 = vpop.permute.xlu0 %1204  ;;  %v1165_v24 = vpop.permute.xlu1 %1164 }
 0x285   : > { %v1166_v32 = vsel %vm601_vm6, %v1163_v3, %v1165_v24  ;;  %v1169_v42 = vsel %vm601_vm6, %v1165_v24, %v1159_v50 }
 0x286   : > { %v1194_v51 = vmul.f32 %v1183_v28, %v1166_v32  ;;  %v1195_v52 = vmul.f32 %v1187_v29, %v1169_v42  ;;  %v1943_v42 = vld [vmem:[%s2280_s16 + $0x18] sm:$0xff] }
 0x288   : > { %v1203_v30 = vpop.permute.xlu1 %1202  ;;  %v1243_v38 = vpop.permute.xlu0 %1242 }
 0x289   : > { %v1209_v31 = vsel %vm645_vm5, %v1203_v30, %v1205_v23  ;;  %v1210_v33 = vsel %vm645_vm5, %v1201_v14, %v1203_v30 }
 0x28a   : > { %v1234_v39 = vmul.f32 %v1217_v25, %v1210_v33  ;;  %v1235_v40 = vmul.f32 %v1221_v26, %v1209_v31 }
 0x28c   : > { %v1846_v43 = vpack.c.bf16 %v1234_v39, %v1192_v36  ;;  %v1207_v44 = vpop.permute.xlu1 %1206  ;;  %v1844_v45 = vpack.c.bf16 %v1235_v40, %v1193_v37  ;;  %v1247_v50 = vpop.permute.xlu0 %1246 }
 0x28d   : > { %v1208_v46 = vsel %vm645_vm5, %v1205_v23, %v1207_v44  ;;  %v1211_v47 = vsel %vm645_vm5, %v1207_v44, %v1201_v14  ;;  %v1944_v44 = vld [vmem:[%s2280_s16] sm:$0xff] }
 0x28e   : > { %v1236_v53 = vmul.f32 %v1225_v34, %v1208_v46  ;;  %v1237_v54 = vmul.f32 %v1229_v35, %v1211_v47  ;;  %1845 = vmatprep.subr.bf16.mxu0 %v1844_v45  ;;  %v1945_v46 = vld [vmem:[%s2280_s16 + $0x8] sm:$0xff]  ;;  %s2092_s16 = smov [#allocation8]  }
 0x28f   : > { %1847 = vmatpush1.bf16.msra.mxu0 %v1846_v43  ;;  %s2008_s18 = sshll.u32 %s2092_s16, 4  ;;  %s2009_s18 = int_to_ptr.vmem [resolvable:$false] %s2008_s18 }
 0x290   : > { %v1862_v55 = vpack.c.bf16 %v1236_v53, %v1194_v51  ;;  %v1245_v56 = vpop.permute.xlu1 %1244  ;;  %v1860_v57 = vpack.c.bf16 %v1237_v54, %v1195_v52  ;;  %s2010_s19 = scalar_lea.vmem %s2009_s18, 1024  ;;  %p2011_p10 = scmp.lt.s32.totalorder %s2706_s17, %s2009_s18 }
 0x291   : > { %v1251_v58 = vsel %vm689_vm7, %v1245_v56, %v1247_v50  ;;  %v1252_v59 = vsel %vm689_vm7, %v1243_v38, %v1245_v56  ;;  %p2012_p13 = scmp.lt.s32.totalorder %s2010_s19, %s2004_s21 }
 0x292   : > { %v1276_v60 = vmul.f32 %v1259_v48, %v1252_v59  ;;  %v1277_v15 = vmul.f32 %v1263_v49, %v1251_v58  ;;  %1861 = vmatprep.subr.bf16.mxu1 %v1860_v57 }
 0x293   : > { %1863 = vmatpush1.bf16.msra.mxu1 %v1862_v55  ;;  %p2013_p3 = por %p2012_p13, %p2011_p10 }
 0x294   : > { %v1249_v3 = vpop.permute.xlu1 %1248  ;;  %1346 = vmatprep.subr.mxu0 %v1277_v15 }
 0x295   : > { %v1250_v62 = vsel %vm689_vm7, %v1247_v50, %v1249_v3  ;;  %v1253_v13 = vsel %vm689_vm7, %v1249_v3, %v1243_v38  ;;  %1347 = vmatpush1.msra.mxu0 %v1276_v60  ;;  %p2014_p7 = pnand %p2013_p3, %p2007_p8 }
 0x296   : > { %v1278_v2 = vmul.f32 %v1267_v12, %v1250_v62  ;;  %v1279_v63 = vmul.f32 %v1271_v61, %v1253_v13  ;;  %1773 = vmatmul.mubr.msk.f32.vlgmr.msra.gmra.mrb[2].mxu0 %vm768_vm8, %v1284_v9  ;;  %1790 = vmatprep.subr.mxu0 %v2087_v4 }
 0x297   : > { %1792 = vmatprep.mubr.msk.f32.mxu0 %vm2090_vm9, %v2087_v4 }
 0x298   : > { %1417 = vmatprep.subr.mxu1 %v1279_v63 }
 0x299   : > { %1418 = vmatpush1.msra.mxu1 %v1278_v2 }
 0x29a   : > { %1774 = vmatmul.mubr.msk.f32.vlgmr.msra.gmra.mrb[2].mxu1 %vm768_vm8, %v1284_v9  ;;  %1795 = vmatprep.subr.mxu1 %v2087_v4 }
 0x29b   : > { %1797 = vmatprep.mubr.msk.f32.mxu1 %vm2090_vm9, %v2087_v4  ;;  %v1559_v4 = vld [vmem:[%s2755_s7] sm:$0xff] }
 0x29d   : > { %v1325_v16 = vpop.permute.xlu0 %1324 }
 0x369   : > { %v1396_v19 = vpop.f32.mrb[2].mxu0 }
 0x36a   : > { %v1397_v1 = vadd.f32 %v1396_v19, %v1325_v16  ;;  %v1398_v5 = vpop.f32.mrb[3].mxu0 }
 0x36b   : > { %v1399_v0 = vadd.f32 %v1398_v5, %v1325_v16 }
 0x36d   : > { %v1467_v11 = vpop.f32.mrb[2].mxu1  ;;  %v1472_v6 = vadd.f32 %v1399_v0, %v1397_v1 }
 0x36e   : > { %v1468_v10 = vadd.f32 %v1467_v11, %v1325_v16  ;;  %v1469_v14 = vpop.f32.mrb[3].mxu1 }
 0x36f   : > { %v1470_v18 = vadd.f32 %v1469_v14, %v1325_v16  ;;  %1473 = vadd.xlane.f32.xlu1 %v1472_v6 }
 0x371   : > { %v1477_v20 = vadd.f32 %v1470_v18, %v1468_v10 }
 0x373   : > { %1478 = vadd.xlane.f32.xlu0 %v1477_v20 }
 0x3fc   : > { %v1474_v21 = vpop.xlane.xlu1 %1473 }
 0x3fd   : > { %v1476_v23 = vmul.f32 0.00390625, %v1474_v21 }
 0x400   : > { %v1479_v22 = vpop.xlane.xlu0 %1478 }
 0x401   : > { %v1480_v24 = vmul.f32 0.00390625, %v1479_v22 }
 0x403   : > { %v1482_v8 = vsel %vm1481_vm10, %v1476_v23, %v1480_v24 }
 0x404   : > { %1791 = vmatpush3.msra.mxu0 %v1482_v8 }
 0x405   : > { %1793 = vmatmul.mubr.msk.f32.vlgmr.msra.gmra.mrb[4].mxu0 %vm1484_vm11, %v1483_v7 }
 0x4d8   : > { %v1554_v25 = vpop.f32.mrb[4].mxu0 }
 0x4d9   : > { %v1558_v26 = vmax.f32 %v1554_v25, 0.0  ;;  %v1794_v17 = vpop.f32.mrb[5].mxu0 }
 0x4db   : > { %1796 = vmatpush3.msk.msra.mxu1 %vm1564_vm12, %v1558_v26 }
 0x4dc   : > { %1798 = vmatmul.mubr.msk.f32.vlgmr.msra.gmra.mrb[4].mxu1 %vm1560_vm13, %v1559_v4 }
 0x5af   : > { %v1634_v28 = vpop.f32.mrb[4].mxu1 }
 0x5b0   : > { %v1778_v29 = vmul.f32 -1.442695, %v1634_v28  ;;  %v1799_v30 = vpop.f32.mrb[5].mxu1 }
 0x5b2   : > { %1938 = vpow2.f32 %v1778_v29 }
 0x5bc   : > { %v1939_v31 = vpop.eup %1938 }
 0x5bd   : > { %v1641_v33 = vadd.f32 1.0, %v1939_v31 }
 0x5bf   : > { %1940 = vrcp.f32 %v1641_v33 }
 0x5c9   : > { %v1941_v34 = vpop.eup %1940 }
 0x5ca   : > { %1656 = vperm.xlu1 %1936, %v1941_v34   ;;  %1646 = vperm.xlu0 %1935, %v1941_v34  }
 0x5ce   : > { %1937 = vset.pattern.permute.xlu0 %v2091_v27 }
 0x649   : > { %v1657_v35 = vpop.permute.xlu1 %1656  ;;  %v1647_v36 = vpop.permute.xlu0 %1646 }
 0x64a   : > { %v1659_v37 = vmul.f32 %v1657_v35, %v1468_v10  ;;  %v1660_v38 = vmul.f32 %v1657_v35, %v1470_v18  ;;  %v1649_v39 = vmul.f32 %v1647_v36, %v1397_v1  ;;  %v1650_v40 = vmul.f32 %v1647_v36, %v1399_v0 }
 0x64c   : > { %v1661_v32 = vadd.f32 %v1942_v41, %v1659_v37  ;;  %v1662_v43 = vadd.f32 %v1943_v42, %v1660_v38  ;;  %v1651_v45 = vadd.f32 %v1944_v44, %v1649_v39  ;;  %v1652_v47 = vadd.f32 %v1945_v46, %v1650_v40 }
 0x64e   : > { %1663 = vst [vmem:[%s336_s10 + $0x10] sm:$0xff] %v1661_v32  ;;  %1664 = vst [vmem:[%s336_s10 + $0x18] sm:$0xff] %v1662_v43 }
 0x64f   : > { %1653 = vst [vmem:[%s336_s10] sm:$0xff] %v1651_v45  ;;  %1654 = vst [vmem:[%s336_s10 + $0x8] sm:$0xff] %v1652_v47 }
 0x650   : > { %2017 = shalt.err (!%p2014_p7)
}
 0x651   : > { %s2018_s20 = scalar_lea.hbm %s2704_s9, 512  ;;  %s2022_s15 = scalar_lea.hbm %s2756_s8, 1024 }
 0x652   : > { %p2019_p9 = scmp.ne.s32.totalorder %s2704_s9, %s2018_s20  ;;  %p2023_p0 = scmp.lt.u32.totalorder %s2704_s9, %s2756_s8 }
 0x653   : > { %p2024_p11 = scmp.lt.u32.totalorder %s2022_s15, %s2018_s20  ;;  %p2026_p4 = scmp.lt.u32.totalorder %s2018_s20, %s2704_s9 }
 0x654   : > { %p2020_p2 = pnand %p2019_p9, %p2229_p12 }
 0x655   : > { %p2025_p1 = por %p2024_p11, %p2023_p0 }
 0x656   : > { %p2021_p5 = pneg %p2020_p2 }
 0x657   : > { %p2027_p6 = por %p2026_p4, %p2025_p1 }
 0x659   : > { %p2028_p8 = pnand %p2027_p6, %p2021_p5 }
 0x65b   : > { %2031 = shalt.err (!%p2028_p8)
}
 0x65c   : > { %1870 = dma.vmem_to_hbm [thread:$0]  (%p2229_p12), %s2706_s17, 512, %s2704_s9, %s1666_s26  }
 0x65d PF: > { %s1692_s13 = sand.u32 1, %s2062_s27   ;;  %p2774_p10 = scmp.ne.s32.totalorder %s2763_s12, 0 }
 0x65e   : > { %p2775_p13 = scmp.ge.s32.totalorder %s2074_s30, 2  ;;  %s1693_s11 = scalar_lea.sflag [#allocation5], %s1692_s13 }
 0x660   : > { %p1881_p3 = pnand %p2775_p13, %p2774_p10 }
 0x662   : > { %2057 = dma.done.wait (!%p1881_p3), %s1693_s11, 512  }
 0x663   : > { %2059 = vsyncadd (!%p1881_p3), %s1693_s11, 4294966784  ;;  %s2776_s30 = sld [smem:[#allocation12_spill]]  ;;  %s2777_s27 = smov %s2066_s28 }
 0x664   : > { %s2778_s28 = smov %s2070_s29  ;;  %s2779_s29 = smov %s2225_s23 }
 0x669   : > { %p22_p7 = scmp.ge.s32.totalorder %s2776_s30, 4  }
 0x66b   :  { %24 = sbr.rel (!%p22_p7) target bundleno = 6 (0x6), region = 109 }
 0x672   :  { %1698 = vsyncpa [#allocation4], 1 }
 0x673   :  { %1700 = vsyncpa [#allocation4 + $0x1], 1 }
 0x674   :  { %1701 = vsyncpa [#allocation7], 1 }
 0x675   :  { %1702 = vsyncpa [#allocation5], 1 }
 0x676   :  { %1704 = vsyncpa [#allocation5 + $0x1], 1 }

</bundles_post_ra>
